<compile_context>
chip_gen: v7x
topology: tpu7x:2x2x1
jax: 0.10.0
libtpu: 0.0.40
codegen_flags: <defaults>
</compile_context>

<pallas_src>
import functools

import jax
import jax.numpy as jnp
from jax.experimental import pallas as pl
from jax.experimental.pallas import tpu as pltpu


_SQRT_HALF = 0.7071067811865476  # 1/sqrt(2) for exact erf-GELU


def _round_up(a, b):
    return pl.cdiv(a, b) * b


def _ln_mlp_res_kernel(x_ref, g_ref, bt_ref, p_ref, w1_ref, b1_ref, w2_ref, b2_ref,
                       o_ref, *, eps, approx_gelu):
    # Folded layout: each row holds G tokens side by side (G * C = 128 lanes when C < 128).
    # x_ref : (TR, CW)   lane-dense tile of folded tokens
    # g_ref : (1, CW)    LayerNorm gamma, tiled G times          (grid-invariant)
    # bt_ref: (1, CW)    LayerNorm beta,  tiled G times
    # p_ref : (CW, CW)   block-diag averaging matrix kron(I_G, 1/C)
    # w1_ref: (CW, HW)   kron(I_G, fc1.weight.T)
    # b1_ref: (1, HW)    fc1 bias, tiled G times (f32)
    # w2_ref: (HW, CW)   kron(I_G, fc2.weight.T)
    # b2_ref: (1, CW)    fc2 bias, tiled G times (f32)
    # o_ref : (TR, CW)   x + Mlp(LayerNorm(x)), still folded / lane-dense
    xf = x_ref[...].astype(jnp.float32)

    # --- per-token LayerNorm statistics on the folded layout -------------------------
    # P broadcasts each token's mean/var back across its own C-lane group, so the whole
    # pipeline stays 128-lane dense and the reduction rides the MXU (f32 accumulation,
    # biased variance == torch.nn.LayerNorm).
    mean = jnp.dot(xf.astype(p_ref.dtype), p_ref[...],
                   preferred_element_type=jnp.float32)
    xc = xf - mean
    var = jnp.dot((xc * xc).astype(p_ref.dtype), p_ref[...],
                  preferred_element_type=jnp.float32)
    xn = xc * jax.lax.rsqrt(var + eps)
    xn = xn * g_ref[...] + bt_ref[...]

    # --- fc1 (bf16 operands by default, f32 accumulation) ----------------------------
    h = jnp.dot(xn.astype(w1_ref.dtype), w1_ref[...],
                preferred_element_type=jnp.float32)
    h = h + b1_ref[...]

    if approx_gelu:
        h = jax.nn.gelu(h, approximate=True)          # tanh -> EUP slot
    else:
        h = 0.5 * h * (1.0 + jax.lax.erf(h * _SQRT_HALF))   # torch.nn.GELU() parity

    # dropout p=0.0 -> identity

    # --- fc2 --------------------------------------------------------------------------
    y = jnp.dot(h.astype(w2_ref.dtype), w2_ref[...],
                preferred_element_type=jnp.float32)
    y = y + b2_ref[...]

    # --- residual (drop_path identity); re-read x instead of keeping an f32 copy alive
    o_ref[...] = (x_ref[...].astype(jnp.float32) + y).astype(o_ref.dtype)


def ln_mlp_residual_pallas(x, gamma, beta, w1, b1, w2, b2, *,
                           tile_m=None, eps=1e-5,
                           mxu_dtype=jnp.bfloat16,
                           approximate_gelu=False):
    """x: (B, N, C). Computes x + Mlp(LayerNorm(x)).

    Weights in (in, out) layout (transpose of torch nn.Linear.weight).
    mxu_dtype controls the matmul operand dtype (bf16 by default for full MXU rate;
    use jnp.float32 for bit-closer torch parity). Arbitrary token counts are handled
    by zero-padding the token dim and slicing the pad rows off afterwards.
    """
    B, N, C = x.shape
    H = w1.shape[1]
    assert w1.shape == (C, H) and w2.shape == (H, C)
    M = B * N

    # --- lane folding: pack G tokens per row so the last dim fills all 128 lanes -----
    G = (128 // C) if (C < 128 and 128 % C == 0) else 1
    CW, HW = G * C, G * H
    Mf = pl.cdiv(M, G)                                   # folded rows of real tokens

    x_itemsize = jnp.dtype(x.dtype).itemsize
    w_itemsize = jnp.dtype(mxu_dtype).itemsize
    pack = {1: 32, 2: 16, 4: 8}.get(x_itemsize, 8)       # sublane packing of x dtype

    # --- VMEM budget -> row-tile cap ---------------------------------------------------
    w_bytes = (2 * CW * HW + CW * CW) * w_itemsize + (HW + 3 * CW) * 4
    single_buffer_params = w_bytes > (1 << 20)           # don't double-buffer big invariant weights
    param_bufs = 1 if single_buffer_params else 2
    row_bytes = 4 * CW * x_itemsize + (3 * CW + HW) * 4  # x/out double-buffers + f32 temps
    budget = 24 << 20                                    # keep well under v7x's 64 MiB physical VMEM
    cap_rows = max(pack, (budget - param_bufs * w_bytes) // row_bytes)

    if tile_m is None:
        tile_m = 4096 if C <= 64 else 512                # big tiles amortise ~0.35 us/step
    tile_rows = max(1, int(tile_m) // G)
    tile_rows = min(tile_rows, cap_rows, _round_up(Mf, pack))
    if M >= 4096:
        # megacore: keep >= 2 grid steps per TensorCore (>= 4 total) so each core pipelines
        tile_rows = min(tile_rows, _round_up(pl.cdiv(Mf, 4), pack))
    tile_rows = max(pack, _round_up(tile_rows, pack))

    grid_m = pl.cdiv(Mf, tile_rows)
    Mf_pad = grid_m * tile_rows
    M_pad = Mf_pad * G

    # --- fold x to the lane-dense layout (pad rows are zeros; LN on them is finite) ---
    x2d = x.reshape(M, C)
    if M_pad != M:
        x2d = jnp.pad(x2d, ((0, M_pad - M), (0, 0)))
    x_fold = x2d.reshape(Mf_pad, CW)

    f32 = jnp.float32
    gamma_f = jnp.tile(gamma.astype(f32).reshape(1, C), (1, G))
    beta_f = jnp.tile(beta.astype(f32).reshape(1, C), (1, G))
    b1_f = jnp.tile(b1.astype(f32).reshape(1, H), (1, G))
    b2_f = jnp.tile(b2.astype(f32).reshape(1, C), (1, G))

    eye_g = jnp.eye(G, dtype=f32)
    p_mat = jnp.kron(eye_g, jnp.full((C, C), 1.0 / C, dtype=f32)).astype(mxu_dtype)
    w1_blk = jnp.kron(eye_g, w1.astype(f32)).astype(mxu_dtype)
    w2_blk = jnp.kron(eye_g, w2.astype(f32)).astype(mxu_dtype)

    cost = pl.CostEstimate(
        flops=int(Mf_pad * (4 * CW * HW + 4 * CW * CW + 12 * CW)),
        transcendentals=int(Mf_pad * HW),                # erf (or tanh) in GELU
        bytes_accessed=int(2 * Mf_pad * CW * x_itemsize + w_bytes),
    )

    est_vmem = param_bufs * w_bytes + tile_rows * row_bytes
    vmem_limit = int(min(max(2 * est_vmem, 32 << 20), 56 << 20))

    if single_buffer_params:
        def _pspec(shape):
            return pl.BlockSpec(shape, lambda i: (0, 0), pipeline_mode=pl.Buffered(1))
    else:
        def _pspec(shape):
            return pl.BlockSpec(shape, lambda i: (0, 0))

    kernel = functools.partial(_ln_mlp_res_kernel, eps=eps, approx_gelu=approximate_gelu)

    out_fold = pl.pallas_call(
        kernel,
        out_shape=jax.ShapeDtypeStruct((Mf_pad, CW), x.dtype),
        grid_spec=pl.GridSpec(
            grid=(grid_m,),
            in_specs=[
                pl.BlockSpec((tile_rows, CW), lambda i: (i, 0)),   # x (folded, lane-dense)
                _pspec((1, CW)),        # gamma   (grid-invariant)
                _pspec((1, CW)),        # beta
                _pspec((CW, CW)),       # P
                _pspec((CW, HW)),       # w1 (block-diag)
                _pspec((1, HW)),        # b1
                _pspec((HW, CW)),       # w2 (block-diag)
                _pspec((1, CW)),        # b2
            ],
            out_specs=pl.BlockSpec((tile_rows, CW), lambda i: (i, 0)),
        ),
        compiler_params=pltpu.CompilerParams(
            dimension_semantics=("parallel",),
            vmem_limit_bytes=vmem_limit,
        ),
        cost_estimate=cost,
    )(x_fold, gamma_f, beta_f, p_mat, w1_blk, b1_f, w2_blk, b2_f)

    out2d = out_fold.reshape(M_pad, C)
    if M_pad != M:
        out2d = out2d[:M]
    return out2d.reshape(B, N, C)


def ln_mlp_residual_reference(x, gamma, beta, w1, b1, w2, b2, eps=1e-5):
    xf = x.astype(jnp.float32)
    mean = jnp.mean(xf, axis=-1, keepdims=True)
    xc = xf - mean
    var = jnp.mean(xc * xc, axis=-1, keepdims=True)
    xn = xc * jax.lax.rsqrt(var + eps)
    xn = xn * gamma.astype(jnp.float32) + beta.astype(jnp.float32)
    h = jnp.einsum("bnc,ch->bnh", xn, w1.astype(jnp.float32)) + b1.astype(jnp.float32)
    h = 0.5 * h * (1.0 + jax.lax.erf(h * _SQRT_HALF))
    y = jnp.einsum("bnh,ho->bno", h, w2.astype(jnp.float32)) + b2.astype(jnp.float32)
    return (xf + y).astype(x.dtype)


if __name__ == "__main__":
    # Shapes consistent with a BasicUformerLayer stage:
    #   dim=32, input_resolution=(16, 16) -> N = 256 tokens, mlp_ratio=4 -> hidden=128
    B = 2
    res = 16
    N = res * res
    C = 32
    Hh = 128

    key = jax.random.PRNGKey(0)
    kx, kg, kb, kw1, kb1, kw2, kb2 = jax.random.split(key, 7)

    x = jax.random.normal(kx, (B, N, C), dtype=jnp.float32)
    gamma = 1.0 + 0.1 * jax.random.normal(kg, (C,), dtype=jnp.float32)
    beta = 0.1 * jax.random.normal(kb, (C,), dtype=jnp.float32)

    # Deterministic parameter init (uniform, roughly nn.Linear's scale), stored (in, out).
    lim1 = 1.0 / (C ** 0.5)
    lim2 = 1.0 / (Hh ** 0.5)
    w1 = jax.random.uniform(kw1, (C, Hh), minval=-lim1, maxval=lim1, dtype=jnp.float32)
    b1 = jax.random.uniform(kb1, (Hh,), minval=-lim1, maxval=lim1, dtype=jnp.float32)
    w2 = jax.random.uniform(kw2, (Hh, C), minval=-lim2, maxval=lim2, dtype=jnp.float32)
    b2 = jax.random.uniform(kb2, (C,), minval=-lim2, maxval=lim2, dtype=jnp.float32)

    y_ref = ln_mlp_residual_reference(x, gamma, beta, w1, b1, w2, b2)

    # Exact-parity path (f32 MXU operands) -> tight tolerance.
    run_f32 = jax.jit(functools.partial(ln_mlp_residual_pallas, mxu_dtype=jnp.float32))
    y32 = jax.block_until_ready(run_f32(x, gamma, beta, w1, b1, w2, b2))
    err32 = float(jnp.max(jnp.abs(y32 - y_ref)))
    assert err32 < 5e-4, f"f32 path mismatch vs reference: max abs err {err32}"

    # Default fast path (bf16 MXU operands, f32 accumulation) -> bf16-level tolerance.
    run_bf16 = jax.jit(ln_mlp_residual_pallas)
    y16 = jax.block_until_ready(run_bf16(x, gamma, beta, w1, b1, w2, b2))
    err16 = float(jnp.max(jnp.abs(y16 - y_ref)))
    assert err16 < 1e-1, f"bf16 path mismatch vs reference: max abs err {err16}"

    # Ragged token count exercises the fold + cdiv + zero-padded tail path.
    x_odd = x[:, :200, :]
    y_odd = jax.block_until_ready(run_bf16(x_odd, gamma, beta, w1, b1, w2, b2))
    y_odd_ref = ln_mlp_residual_reference(x_odd, gamma, beta, w1, b1, w2, b2)
    err_odd = float(jnp.max(jnp.abs(y_odd - y_odd_ref)))
    assert err_odd < 1e-1, f"tail-path mismatch vs reference: max abs err {err_odd}"

    print("KERNEL_OK")
</pallas_src>

<mosaic_0001>
module attributes {stable_mosaic.version = 11 : i64} {
  func.func @_ln_mlp_res_kernel(%arg0: i32, %arg1: memref<128x128xf32, #tpu.memory_space<vmem>>, %arg2: memref<1x128xf32, #tpu.memory_space<vmem>>, %arg3: memref<1x128xf32, #tpu.memory_space<vmem>>, %arg4: memref<128x128xf32, #tpu.memory_space<vmem>>, %arg5: memref<128x512xf32, #tpu.memory_space<vmem>>, %arg6: memref<1x512xf32, #tpu.memory_space<vmem>>, %arg7: memref<512x128xf32, #tpu.memory_space<vmem>>, %arg8: memref<1x128xf32, #tpu.memory_space<vmem>>, %arg9: memref<128x128xf32, #tpu.memory_space<vmem>>) attributes {dimension_semantics = [#tpu.dimension_semantics<parallel>], iteration_bounds = array<i64: 1>, scalar_prefetch = 0 : i64, scratch_operands = 0 : i64, tpu.core_type = #tpu.core_type<tc>, window_params = [{transform_indices = @transform_0, window_bounds = array<i64: 128, 128>}, {pipeline_mode = #tpu.pipeline_mode<synchronous>, transform_indices = @transform_1, window_bounds = array<i64: 1, 128>}, {pipeline_mode = #tpu.pipeline_mode<synchronous>, transform_indices = @transform_2, window_bounds = array<i64: 1, 128>}, {pipeline_mode = #tpu.pipeline_mode<synchronous>, transform_indices = @transform_3, window_bounds = array<i64: 128, 128>}, {pipeline_mode = #tpu.pipeline_mode<synchronous>, transform_indices = @transform_4, window_bounds = array<i64: 128, 512>}, {pipeline_mode = #tpu.pipeline_mode<synchronous>, transform_indices = @transform_5, window_bounds = array<i64: 1, 512>}, {pipeline_mode = #tpu.pipeline_mode<synchronous>, transform_indices = @transform_6, window_bounds = array<i64: 512, 128>}, {pipeline_mode = #tpu.pipeline_mode<synchronous>, transform_indices = @transform_7, window_bounds = array<i64: 1, 128>}, {transform_indices = @transform_8, window_bounds = array<i64: 128, 128>}]} {
    %c0 = arith.constant 0 : index
    %c0_0 = arith.constant 0 : index
    %0 = vector.load %arg1[%c0, %c0_0] : memref<128x128xf32, #tpu.memory_space<vmem>>, vector<128x128xf32>
    %c0_1 = arith.constant 0 : index
    %c0_2 = arith.constant 0 : index
    %1 = vector.load %arg4[%c0_1, %c0_2] : memref<128x128xf32, #tpu.memory_space<vmem>>, vector<128x128xf32>
    %cst = arith.constant dense<0.000000e+00> : vector<128x128xf32>
    %2 = tpu.matmul %0, %1, %cst {dimension_numbers = #tpu.dot_dimension_numbers<[1], [0], [0], [1], [0, 0, 1, 1], [], []>} : vector<128x128xf32>, vector<128x128xf32>, vector<128x128xf32> -> vector<128x128xf32>
    %3 = arith.subf %0, %2 : vector<128x128xf32>
    %4 = arith.mulf %3, %3 : vector<128x128xf32>
    %c0_3 = arith.constant 0 : index
    %c0_4 = arith.constant 0 : index
    %5 = vector.load %arg4[%c0_3, %c0_4] : memref<128x128xf32, #tpu.memory_space<vmem>>, vector<128x128xf32>
    %cst_5 = arith.constant dense<0.000000e+00> : vector<128x128xf32>
    %6 = tpu.matmul %4, %5, %cst_5 {dimension_numbers = #tpu.dot_dimension_numbers<[1], [0], [0], [1], [0, 0, 1, 1], [], []>} : vector<128x128xf32>, vector<128x128xf32>, vector<128x128xf32> -> vector<128x128xf32>
    %cst_6 = arith.constant 9.99999974E-6 : f32
    %7 = vector.broadcast %cst_6 : f32 to vector<128x128xf32>
    %8 = arith.addf %6, %7 : vector<128x128xf32>
    %9 = math.rsqrt %8 : vector<128x128xf32>
    %10 = arith.mulf %3, %9 : vector<128x128xf32>
    %c0_7 = arith.constant 0 : index
    %c0_8 = arith.constant 0 : index
    %11 = vector.load %arg2[%c0_7, %c0_8] : memref<1x128xf32, #tpu.memory_space<vmem>>, vector<1x128xf32>
    %12 = vector.broadcast %11 : vector<1x128xf32> to vector<128x128xf32>
    %13 = arith.mulf %10, %12 : vector<128x128xf32>
    %c0_9 = arith.constant 0 : index
    %c0_10 = arith.constant 0 : index
    %14 = vector.load %arg3[%c0_9, %c0_10] : memref<1x128xf32, #tpu.memory_space<vmem>>, vector<1x128xf32>
    %15 = vector.broadcast %14 : vector<1x128xf32> to vector<128x128xf32>
    %16 = arith.addf %13, %15 : vector<128x128xf32>
    %c0_11 = arith.constant 0 : index
    %c0_12 = arith.constant 0 : index
    %17 = vector.load %arg5[%c0_11, %c0_12] : memref<128x512xf32, #tpu.memory_space<vmem>>, vector<128x512xf32>
    %cst_13 = arith.constant dense<0.000000e+00> : vector<128x512xf32>
    %18 = tpu.matmul %16, %17, %cst_13 {dimension_numbers = #tpu.dot_dimension_numbers<[1], [0], [0], [1], [0, 0, 1, 1], [], []>} : vector<128x128xf32>, vector<128x512xf32>, vector<128x512xf32> -> vector<128x512xf32>
    %c0_14 = arith.constant 0 : index
    %c0_15 = arith.constant 0 : index
    %19 = vector.load %arg6[%c0_14, %c0_15] : memref<1x512xf32, #tpu.memory_space<vmem>>, vector<1x512xf32>
    %20 = vector.broadcast %19 : vector<1x512xf32> to vector<128x512xf32>
    %21 = arith.addf %18, %20 : vector<128x512xf32>
    %cst_16 = arith.constant 5.000000e-01 : f32
    %22 = vector.broadcast %cst_16 : f32 to vector<128x512xf32>
    %23 = arith.mulf %22, %21 : vector<128x512xf32>
    %cst_17 = arith.constant 0.707106769 : f32
    %24 = vector.broadcast %cst_17 : f32 to vector<128x512xf32>
    %25 = arith.mulf %21, %24 : vector<128x512xf32>
    %26 = math.erf %25 : vector<128x512xf32>
    %cst_18 = arith.constant 1.000000e+00 : f32
    %27 = vector.broadcast %cst_18 : f32 to vector<128x512xf32>
    %28 = arith.addf %27, %26 : vector<128x512xf32>
    %29 = arith.mulf %23, %28 : vector<128x512xf32>
    %c0_19 = arith.constant 0 : index
    %c0_20 = arith.constant 0 : index
    %30 = vector.load %arg7[%c0_19, %c0_20] : memref<512x128xf32, #tpu.memory_space<vmem>>, vector<512x128xf32>
    %cst_21 = arith.constant dense<0.000000e+00> : vector<128x128xf32>
    %31 = tpu.matmul %29, %30, %cst_21 {dimension_numbers = #tpu.dot_dimension_numbers<[1], [0], [0], [1], [0, 0, 1, 1], [], []>} : vector<128x512xf32>, vector<512x128xf32>, vector<128x128xf32> -> vector<128x128xf32>
    %c0_22 = arith.constant 0 : index
    %c0_23 = arith.constant 0 : index
    %32 = vector.load %arg8[%c0_22, %c0_23] : memref<1x128xf32, #tpu.memory_space<vmem>>, vector<1x128xf32>
    %33 = vector.broadcast %32 : vector<1x128xf32> to vector<128x128xf32>
    %34 = arith.addf %31, %33 : vector<128x128xf32>
    %c0_24 = arith.constant 0 : index
    %c0_25 = arith.constant 0 : index
    %35 = vector.load %arg1[%c0_24, %c0_25] : memref<128x128xf32, #tpu.memory_space<vmem>>, vector<128x128xf32>
    %36 = arith.addf %35, %34 : vector<128x128xf32>
    %c0_26 = arith.constant 0 : index
    %c0_27 = arith.constant 0 : index
    %37 = vector.load %arg9[%c0_26, %c0_27] : memref<128x128xf32, #tpu.memory_space<vmem>>, vector<128x128xf32>
    tpu.vector_store %arg9[%c0_26, %c0_27], %36 {strides = array<i32>} : memref<128x128xf32, #tpu.memory_space<vmem>>, vector<128x128xf32>,
    return
  }
  func.func @transform_0(%arg0: i32) -> (i32, i32) {
    %c0_i32 = arith.constant 0 : i32
    %c0_i32_0 = arith.constant 0 : i32
    return %arg0, %c0_i32 : i32, i32
  }
  func.func @transform_1(%arg0: i32) -> (i32, i32) {
    %c0_i32 = arith.constant 0 : i32
    %c0_i32_0 = arith.constant 0 : i32
    %c0_i32_1 = arith.constant 0 : i32
    return %c0_i32, %c0_i32_0 : i32, i32
  }
  func.func @transform_2(%arg0: i32) -> (i32, i32) {
    %c0_i32 = arith.constant 0 : i32
    %c0_i32_0 = arith.constant 0 : i32
    %c0_i32_1 = arith.constant 0 : i32
    return %c0_i32, %c0_i32_0 : i32, i32
  }
  func.func @transform_3(%arg0: i32) -> (i32, i32) {
    %c0_i32 = arith.constant 0 : i32
    %c0_i32_0 = arith.constant 0 : i32
    %c0_i32_1 = arith.constant 0 : i32
    return %c0_i32, %c0_i32_0 : i32, i32
  }
  func.func @transform_4(%arg0: i32) -> (i32, i32) {
    %c0_i32 = arith.constant 0 : i32
    %c0_i32_0 = arith.constant 0 : i32
    %c0_i32_1 = arith.constant 0 : i32
    return %c0_i32, %c0_i32_0 : i32, i32
  }
  func.func @transform_5(%arg0: i32) -> (i32, i32) {
    %c0_i32 = arith.constant 0 : i32
    %c0_i32_0 = arith.constant 0 : i32
    %c0_i32_1 = arith.constant 0 : i32
    return %c0_i32, %c0_i32_0 : i32, i32
  }
  func.func @transform_6(%arg0: i32) -> (i32, i32) {
    %c0_i32 = arith.constant 0 : i32
    %c0_i32_0 = arith.constant 0 : i32
    %c0_i32_1 = arith.constant 0 : i32
    return %c0_i32, %c0_i32_0 : i32, i32
  }
  func.func @transform_7(%arg0: i32) -> (i32, i32) {
    %c0_i32 = arith.constant 0 : i32
    %c0_i32_0 = arith.constant 0 : i32
    %c0_i32_1 = arith.constant 0 : i32
    return %c0_i32, %c0_i32_0 : i32, i32
  }
  func.func @transform_8(%arg0: i32) -> (i32, i32) {
    %c0_i32 = arith.constant 0 : i32
    %c0_i32_0 = arith.constant 0 : i32
    return %arg0, %c0_i32 : i32, i32
  }
}

</mosaic_0001>

<bundles_post_ra>
// kernel: ln_mlp_residual_pallas.1
= control target key start
LH: loop header
LB: loop body
LE: loop exit
PB: predicated region body
PF: predicated region fallthrough
CT: control target
= control target key end

     0   :  { %s3616_s3 = inlined_call_operand.vmem [shape: f32[128,128], index: 3, kind: input, shape index: {}]   ;;  %s3617_s0 = inlined_call_operand.vmem [shape: f32[128,128], index: 0, kind: input, shape index: {}]   ;;  %s3618_s4 = inlined_call_operand.vmem [shape: f32[128,512], index: 4, kind: input, shape index: {}]   ;;  %s3619_s6 = inlined_call_operand.vmem [shape: f32[512,128], index: 6, kind: input, shape index: {}]   ;;  %s3620_s1 = inlined_call_operand.vmem [shape: f32[1,128], index: 1, kind: input, shape index: {}]   ;;  %s3621_s2 = inlined_call_operand.vmem [shape: f32[1,128], index: 2, kind: input, shape index: {}]   ;;  %s3622_s5 = inlined_call_operand.vmem [shape: f32[1,512], index: 5, kind: input, shape index: {}]   ;;  %s3623_s7 = inlined_call_operand.vmem [shape: f32[1,128], index: 7, kind: input, shape index: {}]   ;;  %s3624_s8 = inlined_call_operand.vmem [shape: f32[128,128], index: 8, kind: output, shape index: {}]  }
   0x1   :  { %v45_v0 = vld [vmem:[%s3616_s3] sm:$0xff]  ;;  %v46_v1 = vld [vmem:[%s3616_s3 + $0x8] sm:$0xff]  ;;  %v47_v2 = vld [vmem:[%s3616_s3 + $0x10] sm:$0xff] }
   0x2   :  { %v1925_v3 = vpack.c.bf16 %v46_v1, %v45_v0  ;;  %v48_v4 = vld [vmem:[%s3616_s3 + $0x18] sm:$0xff]  ;;  %v49_v6 = vld [vmem:[%s3616_s3 + $0x20] sm:$0xff]  ;;  %v50_v7 = vld [vmem:[%s3616_s3 + $0x28] sm:$0xff] }
   0x3   :  { %v1929_v5 = vpack.c.bf16 %v48_v4, %v47_v2  ;;  %v1933_v8 = vpack.c.bf16 %v50_v7, %v49_v6  ;;  %v2361_v9 = vld [vmem:[%s3617_s0] sm:$0xff]  ;;  %v51_v10 = vld [vmem:[%s3616_s3 + $0x30] sm:$0xff]  ;;  %v52_v11 = vld [vmem:[%s3616_s3 + $0x38] sm:$0xff] }
   0x4   :  { %1926 = vmatprep.subr.bf16.mxu0 %v1925_v3  ;;  %1958 = vmatprep.subr.bf16.mxu1 %v1925_v3  ;;  %v1937_v12 = vpack.c.bf16 %v52_v11, %v51_v10  ;;  %v53_v13 = vld [vmem:[%s3616_s3 + $0x40] sm:$0xff]  ;;  %v54_v14 = vld [vmem:[%s3616_s3 + $0x48] sm:$0xff]  ;;  %v55_v16 = vld [vmem:[%s3616_s3 + $0x50] sm:$0xff] }
   0x5   :  { %1928 = vmatpush3.bf16.msra.mxu0 %v1925_v3  ;;  %1960 = vmatpush3.bf16.msra.mxu1 %v1925_v3  ;;  %v1941_v15 = vpack.c.bf16 %v54_v14, %v53_v13  ;;  %v56_v17 = vld [vmem:[%s3616_s3 + $0x58] sm:$0xff]  ;;  %v57_v19 = vld [vmem:[%s3616_s3 + $0x60] sm:$0xff]  ;;  %v58_v20 = vld [vmem:[%s3616_s3 + $0x68] sm:$0xff] }
   0x6   :  { %1930 = vmatprep.subr.bf16.mxu0 %v1929_v5  ;;  %1962 = vmatprep.subr.bf16.mxu1 %v1929_v5  ;;  %v1945_v18 = vpack.c.bf16 %v56_v17, %v55_v16  ;;  %v1949_v21 = vpack.c.bf16 %v58_v20, %v57_v19  ;;  %v59_v22 = vld [vmem:[%s3616_s3 + $0x70] sm:$0xff]  ;;  %v60_v23 = vld [vmem:[%s3616_s3 + $0x78] sm:$0xff]  ;;  %v30_v25 = vld [vmem:[%s3617_s0 + $0x8] sm:$0xff] }
   0x7   :  { %1845 = vmatprep.mubr.f32.mxu0 %v2361_v9  ;;  %v1953_v24 = vpack.c.bf16 %v60_v23, %v59_v22  ;;  %v2400_v26 = vld [vmem:[%s3617_s0 + $0x10] sm:$0xff]  ;;  %v2406_v27 = vld [vmem:[%s3617_s0 + $0x18] sm:$0xff]  ;;  %v2411_v28 = vld [vmem:[%s3617_s0 + $0x20] sm:$0xff] }
   0x8   :  { %v2418_v29 = vld [vmem:[%s3617_s0 + $0x28] sm:$0xff]  ;;  %v2423_v30 = vld [vmem:[%s3617_s0 + $0x30] sm:$0xff]  ;;  %v2430_v31 = vld [vmem:[%s3617_s0 + $0x38] sm:$0xff] }
   0x9   :  { %1932 = vmatpush3.bf16.msra.mxu0 %v1929_v5  ;;  %1964 = vmatpush3.bf16.msra.mxu1 %v1929_v5  ;;  %v2435_v32 = vld [vmem:[%s3617_s0 + $0x40] sm:$0xff]  ;;  %v2442_v33 = vld [vmem:[%s3617_s0 + $0x48] sm:$0xff]  ;;  %v2447_v34 = vld [vmem:[%s3617_s0 + $0x50] sm:$0xff] }
   0xa   :  { %1934 = vmatprep.subr.bf16.mxu0 %v1933_v8  ;;  %1966 = vmatprep.subr.bf16.mxu1 %v1933_v8  ;;  %v2454_v35 = vld [vmem:[%s3617_s0 + $0x58] sm:$0xff]  ;;  %v2459_v36 = vld [vmem:[%s3617_s0 + $0x60] sm:$0xff]  ;;  %v2466_v37 = vld [vmem:[%s3617_s0 + $0x68] sm:$0xff] }
   0xb   :  { %v2471_v38 = vld [vmem:[%s3617_s0 + $0x70] sm:$0xff]  ;;  %v2478_v39 = vld [vmem:[%s3617_s0 + $0x78] sm:$0xff]  ;;  %v462_v40 = vld [vmem:[%s3618_s4 + $0x8] sm:$0xff] }
   0xc   :  { %v466_v41 = vld [vmem:[%s3618_s4 + $0x28] sm:$0xff]  ;;  %v461_v42 = vld [vmem:[%s3618_s4] sm:$0xff]  ;;  %v464_v45 = vld [vmem:[%s3618_s4 + $0x18] sm:$0xff] }
   0xd   :  { %1936 = vmatpush3.bf16.msra.mxu0 %v1933_v8  ;;  %1968 = vmatpush3.bf16.msra.mxu1 %v1933_v8  ;;  %v1989_v43 = vpack.c.bf16 %v466_v41, %v462_v40  ;;  %v465_v44 = vld [vmem:[%s3618_s4 + $0x20] sm:$0xff]  ;;  %v468_v46 = vld [vmem:[%s3618_s4 + $0x38] sm:$0xff]  ;;  %v470_v49 = vld [vmem:[%s3618_s4 + $0x48] sm:$0xff] }
   0xe   :  { %1938 = vmatprep.subr.bf16.mxu0 %v1937_v12  ;;  %1970 = vmatprep.subr.bf16.mxu1 %v1937_v12  ;;  %v1991_v47 = vpack.c.bf16 %v465_v44, %v461_v42  ;;  %v2021_v48 = vpack.c.bf16 %v468_v46, %v464_v45  ;;  %v474_v50 = vld [vmem:[%s3618_s4 + $0x68] sm:$0xff]  ;;  %v469_v51 = vld [vmem:[%s3618_s4 + $0x40] sm:$0xff]  ;;  %v463_v0 = vld [vmem:[%s3618_s4 + $0x10] sm:$0xff] }
   0xf   :  { %v473_v52 = vld [vmem:[%s3618_s4 + $0x60] sm:$0xff]  ;;  %v1993_v53 = vpack.c.bf16 %v474_v50, %v470_v49  ;;  %v478_v55 = vld [vmem:[%s3618_s4 + $0x88] sm:$0xff]  ;;  %v467_v1 = vld [vmem:[%s3618_s4 + $0x30] sm:$0xff] }
  0x10   :  { %v1995_v54 = vpack.c.bf16 %v473_v52, %v469_v51  ;;  %v482_v56 = vld [vmem:[%s3618_s4 + $0xa8] sm:$0xff]  ;;  %v477_v58 = vld [vmem:[%s3618_s4 + $0x80] sm:$0xff]  ;;  %v472_v3 = vld [vmem:[%s3618_s4 + $0x58] sm:$0xff]  ;;  %v2023_v7 = vpack.c.bf16 %v467_v1, %v463_v0 }
  0x11   :  { %1940 = vmatpush3.bf16.msra.mxu0 %v1937_v12  ;;  %1972 = vmatpush3.bf16.msra.mxu1 %v1937_v12  ;;  %v1997_v57 = vpack.c.bf16 %v482_v56, %v478_v55  ;;  %v481_v59 = vld [vmem:[%s3618_s4 + $0xa0] sm:$0xff]  ;;  %v476_v4 = vld [vmem:[%s3618_s4 + $0x78] sm:$0xff]  ;;  %v471_v12 = vld [vmem:[%s3618_s4 + $0x50] sm:$0xff] }
  0x12   :  { %1942 = vmatprep.subr.bf16.mxu0 %v1941_v15  ;;  %1974 = vmatprep.subr.bf16.mxu1 %v1941_v15  ;;  %v1999_v60 = vpack.c.bf16 %v481_v59, %v477_v58  ;;  %v2025_v11 = vpack.c.bf16 %v476_v4, %v472_v3  ;;  %v475_v13 = vld [vmem:[%s3618_s4 + $0x70] sm:$0xff]  ;;  %v484_v16 = vld [vmem:[%s3618_s4 + $0xb8] sm:$0xff]  ;;  %v485_v1 = vld [vmem:[%s3618_s4 + $0xc0] sm:$0xff] }
  0x13   :  { %v2027_v20 = vpack.c.bf16 %v475_v13, %v471_v12  ;;  %v489_v3 = vld [vmem:[%s3618_s4 + $0xe0] sm:$0xff]  ;;  %v492_v4 = vld [vmem:[%s3618_s4 + $0xf8] sm:$0xff]  ;;  %v498_v12 = vld [vmem:[%s3618_s4 + $0x128] sm:$0xff] }
  0x14   :  { %v496_v13 = vld [vmem:[%s3618_s4 + $0x118] sm:$0xff] }
  0x15   :  { %1944 = vmatpush3.bf16.msra.mxu0 %v1941_v15  ;;  %1976 = vmatpush3.bf16.msra.mxu1 %v1941_v15  ;;  %v480_v15 = vld [vmem:[%s3618_s4 + $0x98] sm:$0xff] }
  0x16   :  { %1946 = vmatprep.subr.bf16.mxu0 %v1945_v18  ;;  %1978 = vmatprep.subr.bf16.mxu1 %v1945_v18  ;;  %v2029_v23 = vpack.c.bf16 %v484_v16, %v480_v15  ;;  %v493_v16 = vld [vmem:[%s3618_s4 + $0x100] sm:$0xff] }
  0x19   :  { %1948 = vmatpush3.bf16.msra.mxu0 %v1945_v18  ;;  %1980 = vmatpush3.bf16.msra.mxu1 %v1945_v18 }
  0x1a   :  { %1950 = vmatprep.subr.bf16.mxu0 %v1949_v21  ;;  %1982 = vmatprep.subr.bf16.mxu1 %v1949_v21 }
  0x1d   :  { %1952 = vmatpush3.bf16.msra.mxu0 %v1949_v21  ;;  %1984 = vmatpush3.bf16.msra.mxu1 %v1949_v21 }
  0x1e   :  { %1954 = vmatprep.subr.bf16.mxu0 %v1953_v24  ;;  %1986 = vmatprep.subr.bf16.mxu1 %v1953_v24 }
  0x21   :  { %1956 = vmatpush3.bf16.msra.mxu0 %v1953_v24  ;;  %1988 = vmatpush3.bf16.msra.mxu1 %v1953_v24  ;;  %v479_v24 = vld [vmem:[%s3618_s4 + $0x90] sm:$0xff] }
  0x22   :  { %1990 = vmatprep.subr.bf16.mxu0 %v1989_v43  ;;  %2022 = vmatprep.subr.bf16.mxu1 %v2021_v48 }
  0x24   :  { %1846 = vmatmul.mubr.f32.vlgmr.msra.gmra.mrb[0].mxu0 %v30_v25 }
  0x25   :  { %1848 = vmatprep.mubr.f32.mxu0 %v2400_v26  ;;  %1992 = vmatpush1.bf16.msra.mxu0 %v1991_v47 }
  0x26   :  { %1994 = vmatprep.subr.bf16.mxu0 %v1993_v53 }
  0x28   :  { %1849 = vmatmul.mubr.f32.gmra.mrb[2].mxu0 %v2406_v27 }
  0x29   :  { %1851 = vmatprep.mubr.f32.mxu0 %v2411_v28  ;;  %1996 = vmatpush1.bf16.msra.mxu0 %v1995_v54 }
  0x2a   :  { %1998 = vmatprep.subr.bf16.mxu0 %v1997_v57 }
  0x2c   :  { %1852 = vmatmul.mubr.f32.gmra.mrb[4].mxu0 %v2418_v29 }
  0x2d   :  { %1854 = vmatprep.mubr.f32.mxu0 %v2423_v30  ;;  %2000 = vmatpush1.bf16.msra.mxu0 %v1999_v60 }
  0x30   :  { %1855 = vmatmul.mubr.f32.gmra.mrb[6].mxu0 %v2430_v31 }
  0x31   :  { %1857 = vmatprep.mubr.f32.mxu0 %v2435_v32 }
  0x34   :  { %1858 = vmatmul.mubr.f32.gmra.mrb[8].mxu0 %v2442_v33 }
  0x35   :  { %1860 = vmatprep.mubr.f32.mxu0 %v2447_v34 }
  0x38   :  { %1861 = vmatmul.mubr.f32.gmra.mrb[10].mxu0 %v2454_v35 }
  0x39   :  { %1863 = vmatprep.mubr.f32.mxu0 %v2459_v36 }
  0x3c   :  { %1864 = vmatmul.mubr.f32.gmra.mrb[12].mxu0 %v2466_v37 }
  0x3d   :  { %1866 = vmatprep.mubr.f32.mxu0 %v2471_v38 }
  0x40   :  { %1867 = vmatmul.mubr.f32.gmra.mrb[14].mxu0 %v2478_v39 }
  0xf7   :  { %v1847_v61 = vpop.f32.mrb[0].mxu0 }
  0xf8   :  { %v2523_v62 = vsub.f32 %v30_v25, %v1847_v61  ;;  %v127_v63 = vpop.f32.mrb[1].mxu0  ;;  %v483_v25 = vld [vmem:[%s3618_s4 + $0xb0] sm:$0xff] }
  0xf9   :  { %v2532_v2 = vsub.f32 %v2361_v9, %v127_v63  ;;  %v2031_v41 = vpack.c.bf16 %v483_v25, %v479_v24  ;;  %v486_v63 = vld [vmem:[%s3618_s4 + $0xc8] sm:$0xff] }
  0xfa   :  { %v223_v8 = vmul.f32 %v2523_v62, %v2523_v62  ;;  %v502_v25 = vld [vmem:[%s3618_s4 + $0x148] sm:$0xff] }
  0xfb   :  { %v1850_v5 = vpop.f32.mrb[2].mxu0  ;;  %v222_v6 = vmul.f32 %v2532_v2, %v2532_v2 }
  0xfc   :  { %v2545_v10 = vsub.f32 %v2406_v27, %v1850_v5  ;;  %v137_v9 = vpop.f32.mrb[3].mxu0  ;;  %v2003_v5 = vpack.c.bf16 %v489_v3, %v485_v1  ;;  %v517_v1 = vld [vmem:[%s3618_s4 + $0x1c0] sm:$0xff] }
  0xfd   :  { %v2554_v14 = vsub.f32 %v2400_v26, %v137_v9  ;;  %1901 = vmatprep.mubr.f32.mxu1 %v222_v6  ;;  %v521_v3 = vld [vmem:[%s3618_s4 + $0x1e0] sm:$0xff] }
  0xfe   :  { %v225_v17 = vmul.f32 %v2545_v10, %v2545_v10  ;;  %1902 = vmatmul.mubr.f32.vlgmr.msra.gmra.mrb[0].mxu1 %v223_v8  ;;  %v491_v8 = vld [vmem:[%s3618_s4 + $0xf0] sm:$0xff] }
  0xff   :  { %v224_v18 = vmul.f32 %v2554_v14, %v2554_v14  ;;  %v1853_v19 = vpop.f32.mrb[4].mxu0  ;;  %2024 = vmatpush1.bf16.msra.mxu1 %v2023_v7  ;;  %v487_v7 = vld [vmem:[%s3618_s4 + $0xd0] sm:$0xff] }
 0x100   :  { %v2567_v21 = vsub.f32 %v2418_v29, %v1853_v19  ;;  %v147_v22 = vpop.f32.mrb[5].mxu0  ;;  %2026 = vmatprep.subr.bf16.mxu1 %v2025_v11  ;;  %v2035_v9 = vpack.c.bf16 %v491_v8, %v487_v7  ;;  %v494_v11 = vld [vmem:[%s3618_s4 + $0x108] sm:$0xff]  ;;  %v519_v7 = vld [vmem:[%s3618_s4 + $0x1d0] sm:$0xff] }
 0x101   :  { %v2576_v26 = vsub.f32 %v2411_v28, %v147_v22  ;;  %1904 = vmatprep.mubr.f32.mxu1 %v224_v18  ;;  %v2005_v15 = vpack.c.bf16 %v498_v12, %v494_v11  ;;  %v500_v18 = vld [vmem:[%s3618_s4 + $0x138] sm:$0xff]  ;;  %v495_v22 = vld [vmem:[%s3618_s4 + $0x110] sm:$0xff]  ;;  %v2294_v11 = vmov 0.0   ;;  %v1205_v12 = vld [vmem:[%s3619_s6 + $0x80] sm:$0xff] }
 0x102   :  { %v227_v27 = vmul.f32 %v2567_v21, %v2567_v21  ;;  %1905 = vmatmul.mubr.f32.gmra.mrb[2].mxu1 %v225_v17  ;;  %v497_v17 = vld [vmem:[%s3618_s4 + $0x120] sm:$0xff]  ;;  %v523_v8 = vld [vmem:[%s3618_s4 + $0x1f0] sm:$0xff]  ;;  %611 = vmatprep.mubr.f32.mxu0 %v2294_v11 }
 0x103   :  { %v226_v29 = vmul.f32 %v2576_v26, %v2576_v26  ;;  %v1856_v40 = vpop.f32.mrb[6].mxu0  ;;  %2028 = vmatpush1.bf16.msra.mxu1 %v2027_v20  ;;  %v2007_v19 = vpack.c.bf16 %v497_v17, %v493_v16  ;;  %v2037_v20 = vpack.c.bf16 %v500_v18, %v496_v13  ;;  %v1206_v13 = vld [vmem:[%s3619_s6 + $0x88] sm:$0xff]  ;;  %v1237_v16 = vld [vmem:[%s3619_s6 + $0x180] sm:$0xff] }
 0x104   :  { %v2583_v42 = vsub.f32 %v2430_v31, %v1856_v40  ;;  %v157_v43 = vpop.f32.mrb[7].mxu0  ;;  %2030 = vmatprep.subr.bf16.mxu1 %v2029_v23  ;;  %v499_v23 = vld [vmem:[%s3618_s4 + $0x130] sm:$0xff]  ;;  %v1238_v17 = vld [vmem:[%s3619_s6 + $0x188] sm:$0xff] }
 0x105   :  { %v2586_v44 = vsub.f32 %v2423_v30, %v157_v43  ;;  %1907 = vmatprep.mubr.f32.mxu1 %v226_v29  ;;  %v2039_v24 = vpack.c.bf16 %v499_v23, %v495_v22  ;;  %v504_v29 = vld [vmem:[%s3618_s4 + $0x158] sm:$0xff]  ;;  %v505_v43 = vld [vmem:[%s3618_s4 + $0x160] sm:$0xff]  ;;  %v2085_v18 = vpack.c.bf16 %v1238_v17, %v1237_v16  ;;  %v1210_v17 = vld [vmem:[%s3619_s6 + $0xa8] sm:$0xff] }
 0x106   :  { %v229_v28 = vmul.f32 %v2583_v42, %v2583_v42  ;;  %1908 = vmatmul.mubr.f32.gmra.mrb[4].mxu1 %v227_v27  ;;  %v506_v27 = vld [vmem:[%s3618_s4 + $0x168] sm:$0xff] }
 0x107   :  { %v228_v45 = vmul.f32 %v2586_v44, %v2586_v44  ;;  %v1859_v46 = vpop.f32.mrb[8].mxu0  ;;  %2032 = vmatpush1.bf16.msra.mxu1 %v2031_v41  ;;  %v2009_v40 = vpack.c.bf16 %v506_v27, %v502_v25  ;;  %v501_v41 = vld [vmem:[%s3618_s4 + $0x140] sm:$0xff] }
 0x108   :  { %v2593_v47 = vsub.f32 %v2442_v33, %v1859_v46  ;;  %v167_v31 = vpop.f32.mrb[9].mxu0 }
 0x109   :  { %v2596_v48 = vsub.f32 %v2435_v32, %v167_v31  ;;  %1910 = vmatprep.mubr.f32.mxu1 %v228_v45  ;;  %v2011_v45 = vpack.c.bf16 %v505_v43, %v501_v41  ;;  %v503_v31 = vld [vmem:[%s3618_s4 + $0x150] sm:$0xff] }
 0x10a   :  { %v231_v30 = vmul.f32 %v2593_v47, %v2593_v47  ;;  %1911 = vmatmul.mubr.f32.gmra.mrb[6].mxu1 %v229_v28  ;;  %v508_v28 = vld [vmem:[%s3618_s4 + $0x178] sm:$0xff] }
 0x10b   :  { %v230_v49 = vmul.f32 %v2596_v48, %v2596_v48  ;;  %v1862_v50 = vpop.f32.mrb[10].mxu0  ;;  %v2041_v46 = vpack.c.bf16 %v508_v28, %v504_v29 }
 0x10c   :  { %v2603_v51 = vsub.f32 %v2454_v35, %v1862_v50  ;;  %v177_v52 = vpop.f32.mrb[11].mxu0  ;;  %v510_v50 = vld [vmem:[%s3618_s4 + $0x188] sm:$0xff] }
 0x10d   :  { %v2606_v33 = vsub.f32 %v2447_v34, %v177_v52  ;;  %1913 = vmatprep.mubr.f32.mxu1 %v230_v49  ;;  %v514_v52 = vld [vmem:[%s3618_s4 + $0x1a8] sm:$0xff] }
 0x10e   :  { %v233_v32 = vmul.f32 %v2603_v51, %v2603_v51  ;;  %1914 = vmatmul.mubr.f32.gmra.mrb[8].mxu1 %v231_v30  ;;  %v507_v30 = vld [vmem:[%s3618_s4 + $0x170] sm:$0xff] }
 0x10f   :  { %v232_v53 = vmul.f32 %v2606_v33, %v2606_v33  ;;  %v1865_v54 = vpop.f32.mrb[12].mxu0  ;;  %v2043_v49 = vpack.c.bf16 %v507_v30, %v503_v31 }
 0x110   :  { %v2613_v55 = vsub.f32 %v2466_v37, %v1865_v54  ;;  %v187_v56 = vpop.f32.mrb[13].mxu0  ;;  %v509_v54 = vld [vmem:[%s3618_s4 + $0x180] sm:$0xff] }
 0x111   :  { %v2616_v35 = vsub.f32 %v2459_v36, %v187_v56  ;;  %1916 = vmatprep.mubr.f32.mxu1 %v232_v53  ;;  %v2013_v53 = vpack.c.bf16 %v514_v52, %v510_v50  ;;  %v513_v56 = vld [vmem:[%s3618_s4 + $0x1a0] sm:$0xff] }
 0x112   :  { %v235_v34 = vmul.f32 %v2613_v55, %v2613_v55  ;;  %1917 = vmatmul.mubr.f32.gmra.mrb[10].mxu1 %v233_v32  ;;  %v512_v32 = vld [vmem:[%s3618_s4 + $0x198] sm:$0xff]  ;;  %v2775_v52 = vld [vmem:[%s3621_s2] ss:$0 sm:$0xff] }
 0x113   :  { %v234_v57 = vmul.f32 %v2616_v35, %v2616_v35  ;;  %v1868_v58 = vpop.f32.mrb[14].mxu0 }
 0x114   :  { %v2623_v59 = vsub.f32 %v2478_v39, %v1868_v58  ;;  %v197_v60 = vpop.f32.mrb[15].mxu0  ;;  %v490_v39 = vld [vmem:[%s3618_s4 + $0xe8] sm:$0xff] }
 0x115   :  { %v2626_v37 = vsub.f32 %v2471_v38, %v197_v60  ;;  %1919 = vmatprep.mubr.f32.mxu1 %v234_v57  ;;  %v488_v38 = vld [vmem:[%s3618_s4 + $0xd8] sm:$0xff]  ;;  %v2001_v0 = vpack.c.bf16 %v490_v39, %v486_v63  ;;  %v2015_v57 = vpack.c.bf16 %v513_v56, %v509_v54  ;;  %v511_v60 = vld [vmem:[%s3618_s4 + $0x190] sm:$0xff]  ;;  %v518_v63 = vld [vmem:[%s3618_s4 + $0x1c8] sm:$0xff] }
 0x116   :  { %v237_v36 = vmul.f32 %v2623_v59, %v2623_v59  ;;  %1920 = vmatmul.mubr.f32.gmra.mrb[12].mxu1 %v235_v34  ;;  %v2033_v6 = vpack.c.bf16 %v492_v4, %v488_v38  ;;  %v516_v34 = vld [vmem:[%s3618_s4 + $0x1b8] sm:$0xff]  ;;  %v522_v39 = vld [vmem:[%s3618_s4 + $0x1e8] sm:$0xff] }
 0x117   :  { %v236_v61 = vmul.f32 %v2626_v37, %v2626_v37  ;;  %2002 = vmatprep.subr.bf16.mxu0 %v2001_v0  ;;  %v2045_v58 = vpack.c.bf16 %v516_v34, %v512_v32  ;;  %v520_v38 = vld [vmem:[%s3618_s4 + $0x1d8] sm:$0xff]  ;;  %v2017_v0 = vpack.c.bf16 %v522_v39, %v518_v63  ;;  %v1190_v54 = vld [vmem:[%s3619_s6 + $0x8] sm:$0xff] }
 0x118   :  { %2004 = vmatpush1.bf16.msra.mxu0 %v2003_v5  ;;  %2034 = vmatprep.subr.bf16.mxu1 %v2033_v6  ;;  %v524_v4 = vld [vmem:[%s3618_s4 + $0x1f8] sm:$0xff]  ;;  %v2019_v5 = vpack.c.bf16 %v521_v3, %v517_v1  ;;  %v1222_v34 = vld [vmem:[%s3619_s6 + $0x108] sm:$0xff] }
 0x119   :  { %1922 = vmatprep.mubr.f32.mxu1 %v236_v61  ;;  %2036 = vmatpush1.bf16.msra.mxu1 %v2035_v9  ;;  %v2049_v6 = vpack.c.bf16 %v524_v4, %v520_v38  ;;  %v2051_v9 = vpack.c.bf16 %v523_v8, %v519_v7  ;;  %v1223_v7 = vld [vmem:[%s3619_s6 + $0x110] sm:$0xff]  ;;  %v1224_v8 = vld [vmem:[%s3619_s6 + $0x118] sm:$0xff] }
 0x11a   :  { %1923 = vmatmul.mubr.f32.gmra.mrb[14].mxu1 %v237_v36  ;;  %2006 = vmatprep.subr.bf16.mxu0 %v2005_v15  ;;  %v515_v36 = vld [vmem:[%s3618_s4 + $0x1b0] sm:$0xff]  ;;  %v2053_v15 = vpack.c.bf16 %v1206_v13, %v1205_v12 }
 0x11b   :  { %2038 = vmatprep.subr.bf16.mxu1 %v2037_v20  ;;  %v2047_v61 = vpack.c.bf16 %v515_v36, %v511_v60  ;;  %772 = vmatprep.mubr.f32.mxu1 %v2294_v11  ;;  %v1208_v60 = vld [vmem:[%s3619_s6 + $0x98] sm:$0xff]  ;;  %v1239_v36 = vld [vmem:[%s3619_s6 + $0x190] sm:$0xff] }
 0x11c   :  { %2008 = vmatpush1.bf16.msra.mxu0 %v2007_v19 }
 0x11d   :  { %2040 = vmatpush1.bf16.msra.mxu1 %v2039_v24  ;;  %2010 = vmatprep.subr.bf16.mxu0 %v2009_v40 }
 0x11e   :  { %2042 = vmatprep.subr.bf16.mxu1 %v2041_v46 }
 0x120   :  { %2012 = vmatpush1.bf16.msra.mxu0 %v2011_v45 }
 0x121   :  { %2044 = vmatpush1.bf16.msra.mxu1 %v2043_v49  ;;  %2014 = vmatprep.subr.bf16.mxu0 %v2013_v53  ;;  %v2769_v49 = vld [vmem:[%s3620_s1] ss:$0 sm:$0xff] }
 0x122   :  { %2046 = vmatprep.subr.bf16.mxu1 %v2045_v58  ;;  %v1189_v53 = vld [vmem:[%s3619_s6] sm:$0xff] }
 0x123   :  { %v2055_v38 = vpack.c.bf16 %v1190_v54, %v1189_v53  ;;  %v1244_v53 = vld [vmem:[%s3619_s6 + $0x1b8] sm:$0xff] }
 0x124   :  { %2016 = vmatpush1.bf16.msra.mxu0 %v2015_v57 }
 0x125   :  { %2048 = vmatpush1.bf16.msra.mxu1 %v2047_v61  ;;  %2018 = vmatprep.subr.bf16.mxu0 %v2017_v0  ;;  %v1240_v61 = vld [vmem:[%s3619_s6 + $0x198] sm:$0xff]  ;;  %v1191_v0 = vld [vmem:[%s3619_s6 + $0x10] sm:$0xff] }
 0x126   :  { %2050 = vmatprep.subr.bf16.mxu1 %v2049_v6  ;;  %v1192_v6 = vld [vmem:[%s3619_s6 + $0x18] sm:$0xff] }
 0x128   :  { %2020 = vmatpush1.bf16.msra.mxu0 %v2019_v5 }
 0x129   :  { %2052 = vmatpush1.bf16.msra.mxu1 %v2051_v9  ;;  %2054 = vmatprep.subr.bf16.mxu0 %v2053_v15  ;;  %v2089_v15 = vpack.c.bf16 %v1240_v61, %v1239_v36  ;;  %v1227_v61 = vld [vmem:[%s3619_s6 + $0x130] sm:$0xff] }
 0x12a   :  { %2086 = vmatprep.subr.bf16.mxu1 %v2085_v18  ;;  %v1241_v18 = vld [vmem:[%s3619_s6 + $0x1a0] sm:$0xff] }
 0x1d1   :  { %v1903_v19 = vpop.f32.mrb[0].mxu1 }
 0x1d2   :  { %v310_v20 = vadd.f32 1e-05, %v1903_v19  ;;  %v304_v22 = vpop.f32.mrb[1].mxu1  ;;  %v1242_v19 = vld [vmem:[%s3619_s6 + $0x1a8] sm:$0xff] }
 0x1d3   :  { %v305_v23 = vadd.f32 1e-05, %v304_v22  ;;  %v2059_v22 = vpack.c.bf16 %v1192_v6, %v1191_v0  ;;  %v1246_v6 = vld [vmem:[%s3619_s6 + $0x1c8] sm:$0xff] }
 0x1d4   :  { %2118 = vrsqrt.f32 %v310_v20 }
 0x1d5   :  { %2120 = vrsqrt.f32 %v305_v23  ;;  %v1906_v24 = vpop.f32.mrb[2].mxu1  ;;  %v2091_v23 = vpack.c.bf16 %v1224_v8, %v1223_v7 }
 0x1d6   :  { %v314_v25 = vpop.f32.mrb[3].mxu1  ;;  %v320_v27 = vadd.f32 1e-05, %v1906_v24  ;;  %v1193_v24 = vld [vmem:[%s3619_s6 + $0x20] sm:$0xff] }
 0x1d7   :  { %v315_v29 = vadd.f32 1e-05, %v314_v25 }
 0x1d9   :  { %2122 = vrsqrt.f32 %v315_v29  ;;  %v1909_v40 = vpop.f32.mrb[4].mxu1 }
 0x1da   :  { %v324_v41 = vpop.f32.mrb[5].mxu1  ;;  %2124 = vrsqrt.f32 %v320_v27  ;;  %v330_v30 = vadd.f32 1e-05, %v1909_v40  ;;  %v1194_v40 = vld [vmem:[%s3619_s6 + $0x28] sm:$0xff] }
 0x1db   :  { %v325_v43 = vadd.f32 1e-05, %v324_v41  ;;  %v1225_v41 = vld [vmem:[%s3619_s6 + $0x120] sm:$0xff] }
 0x1dd   :  { %v1912_v28 = vpop.f32.mrb[6].mxu1  ;;  %2126 = vrsqrt.f32 %v325_v43  ;;  %v1226_v43 = vld [vmem:[%s3619_s6 + $0x128] sm:$0xff] }
 0x1de   :  { %v2119_v45 = vpop.eup %2118  ;;  %v334_v46 = vpop.f32.mrb[7].mxu1  ;;  %2128 = vrsqrt.f32 %v330_v30  ;;  %v340_v20 = vadd.f32 1e-05, %v1912_v28 }
 0x1df   :  { %v2121_v31 = vpop.eup %2120  ;;  %v400_v32 = vmul.f32 %v2119_v45, %v2523_v62  ;;  %v1207_v62 = vld [vmem:[%s3619_s6 + $0x90] sm:$0xff]  ;;  %v335_v39 = vadd.f32 1e-05, %v334_v46  ;;  %v2093_v46 = vpack.c.bf16 %v1242_v19, %v1241_v18  ;;  %v1229_v18 = vld [vmem:[%s3619_s6 + $0x140] sm:$0xff]  ;;  %v1230_v19 = vld [vmem:[%s3619_s6 + $0x148] sm:$0xff] }
 0x1e0   :  { %v399_v50 = vmul.f32 %v2121_v31, %v2532_v2  ;;  %v1221_v2 = vld [vmem:[%s3619_s6 + $0x100] sm:$0xff]  ;;  %v2057_v13 = vpack.c.bf16 %v1208_v60, %v1207_v62  ;;  %v1211_v31 = vld [vmem:[%s3619_s6 + $0xb0] sm:$0xff] }
 0x1e1   :  { %v2784_v56 = vpop.f32.mrb[8].mxu1  ;;  %v423_v3 = vmul.f32 %v2769_v49, %v400_v32  ;;  %v2087_v5 = vpack.c.bf16 %v1222_v34, %v1221_v2  ;;  %2130 = vrsqrt.f32 %v335_v39  ;;  %v1243_v32 = vld [vmem:[%s3619_s6 + $0x1b0] sm:$0xff]  ;;  %v2063_v2 = vpack.c.bf16 %v1194_v40, %v1193_v24  ;;  %v1216_v24 = vld [vmem:[%s3619_s6 + $0xd8] sm:$0xff] }
 0x1e2   :  { %v344_v57 = vpop.f32.mrb[9].mxu1  ;;  %v422_v58 = vmul.f32 %v2769_v49, %v399_v50  ;;  %v1212_v50 = vld [vmem:[%s3619_s6 + $0xb8] sm:$0xff]  ;;  %2132 = vrsqrt.f32 %v340_v20  ;;  %v2095_v34 = vpack.c.bf16 %v1226_v43, %v1225_v41  ;;  %v1195_v62 = vld [vmem:[%s3619_s6 + $0x30] sm:$0xff]  ;;  %v2097_v0 = vpack.c.bf16 %v1244_v53, %v1243_v32 }
 0x1e3   :  { %v2123_v63 = vpop.eup %2122  ;;  %v446_v25 = vadd.f32 %v2775_v52, %v423_v3  ;;  %v345_v54 = vadd.f32 1e-05, %v344_v57  ;;  %v1196_v57 = vld [vmem:[%s3619_s6 + $0x38] sm:$0xff]  ;;  %v350_v7 = vadd.f32 1e-05, %v2784_v56  ;;  %v1198_v56 = vld [vmem:[%s3619_s6 + $0x48] sm:$0xff]  ;;  %v2103_v41 = vpack.c.bf16 %v1230_v19, %v1229_v18 }
 0x1e4   :  { %v445_v1 = vadd.f32 %v2775_v52, %v422_v58  ;;  %v401_v4 = vmul.f32 %v2123_v63, %v2554_v14  ;;  %v2125_v9 = vpop.eup %2124  ;;  %v1209_v14 = vld [vmem:[%s3619_s6 + $0xa0] sm:$0xff]  ;;  %v1228_v63 = vld [vmem:[%s3619_s6 + $0x138] sm:$0xff]  ;;  %v2067_v8 = vpack.c.bf16 %v1196_v57, %v1195_v62 }
 0x1e5   :  { %v2820_v12 = vpop.f32.mrb[10].mxu1  ;;  %v402_v29 = vmul.f32 %v2125_v9, %v2545_v10  ;;  %v2061_v10 = vpack.c.bf16 %v1210_v17, %v1209_v14  ;;  %2134 = vrsqrt.f32 %v345_v54  ;;  %v2099_v9 = vpack.c.bf16 %v1228_v63, %v1227_v61 }
 0x1e6   :  { %v2825_v16 = vpop.f32.mrb[11].mxu1  ;;  %612 = vmatmul.mubr.f32.vlgmr.msra.gmra.mrb[16].mxu0 %v445_v1  ;;  %773 = vmatmul.mubr.f32.vlgmr.msra.gmra.mrb[16].mxu1 %v445_v1  ;;  %v424_v27 = vmul.f32 %v2769_v49, %v401_v4  ;;  %v1213_v1 = vld [vmem:[%s3619_s6 + $0xc0] sm:$0xff]  ;;  %v1214_v4 = vld [vmem:[%s3619_s6 + $0xc8] sm:$0xff]  ;;  %2136 = vrsqrt.f32 %v350_v7  ;;  %v360_v53 = vadd.f32 1e-05, %v2820_v12 }
 0x1e7   :  { %617 = vmatprep.mubr.f32.mxu0 %v2294_v11  ;;  %778 = vmatprep.mubr.f32.mxu1 %v2294_v11  ;;  %v2127_v28 = vpop.eup %2126  ;;  %v425_v60 = vmul.f32 %v2769_v49, %v402_v29  ;;  %v355_v29 = vadd.f32 1e-05, %v2825_v16  ;;  %v1200_v16 = vld [vmem:[%s3619_s6 + $0x58] sm:$0xff] }
 0x1e8   :  { %2056 = vmatpush3.bf16.msra.mxu0 %v2055_v38  ;;  %2088 = vmatpush3.bf16.msra.mxu1 %v2087_v5  ;;  %v447_v58 = vadd.f32 %v2775_v52, %v424_v27  ;;  %v403_v36 = vmul.f32 %v2127_v28, %v2576_v26  ;;  %v2129_v39 = vpop.eup %2128  ;;  %v2065_v26 = vpack.c.bf16 %v1212_v50, %v1211_v31  ;;  %v1245_v5 = vld [vmem:[%s3619_s6 + $0x1c0] sm:$0xff]  ;;  %v1248_v27 = vld [vmem:[%s3619_s6 + $0x1d8] sm:$0xff] }
 0x1e9   :  { %v2853_v45 = vpop.f32.mrb[12].mxu1  ;;  %2058 = vmatprep.subr.bf16.mxu0 %v2057_v13  ;;  %2090 = vmatprep.subr.bf16.mxu1 %v2089_v15  ;;  %v1197_v13 = vld [vmem:[%s3619_s6 + $0x40] sm:$0xff]  ;;  %v448_v15 = vadd.f32 %v2775_v52, %v425_v60  ;;  %v404_v17 = vmul.f32 %v2129_v39, %v2567_v21  ;;  %v1215_v21 = vld [vmem:[%s3619_s6 + $0xd0] sm:$0xff]  ;;  %2138 = vrsqrt.f32 %v355_v29  ;;  %v1250_v29 = vld [vmem:[%s3619_s6 + $0x1e8] sm:$0xff] }
 0x1ea   :  { %v2858_v30 = vpop.f32.mrb[13].mxu1  ;;  %618 = vmatmul.mubr.f32.gmra.mrb[18].mxu0 %v446_v25  ;;  %779 = vmatmul.mubr.f32.gmra.mrb[18].mxu1 %v446_v25  ;;  %v426_v14 = vmul.f32 %v2769_v49, %v403_v36  ;;  %v1247_v25 = vld [vmem:[%s3619_s6 + $0x1d0] sm:$0xff]  ;;  %v2071_v40 = vpack.c.bf16 %v1198_v56, %v1197_v13  ;;  %v2073_v50 = vpack.c.bf16 %v1216_v24, %v1215_v21  ;;  %2140 = vrsqrt.f32 %v360_v53  ;;  %v1204_v53 = vld [vmem:[%s3619_s6 + $0x78] sm:$0xff] }
 0x1eb   :  { %623 = vmatprep.mubr.f32.mxu0 %v2294_v11  ;;  %784 = vmatprep.mubr.f32.mxu1 %v2294_v11  ;;  %v2131_v20 = vpop.eup %2130  ;;  %v427_v28 = vmul.f32 %v2769_v49, %v404_v17  ;;  %v2105_v32 = vpack.c.bf16 %v1248_v27, %v1247_v25  ;;  %v365_v12 = vadd.f32 1e-05, %v2858_v30  ;;  %v370_v57 = vadd.f32 1e-05, %v2853_v45  ;;  %v1201_v25 = vld [vmem:[%s3619_s6 + $0x60] sm:$0xff]  ;;  %v1202_v27 = vld [vmem:[%s3619_s6 + $0x68] sm:$0xff] }
 0x1ec   :  { %2060 = vmatpush3.bf16.msra.mxu0 %v2059_v22  ;;  %2092 = vmatpush3.bf16.msra.mxu1 %v2091_v23  ;;  %v2069_v22 = vpack.c.bf16 %v1214_v4, %v1213_v1  ;;  %v2101_v23 = vpack.c.bf16 %v1246_v6, %v1245_v5  ;;  %v449_v43 = vadd.f32 %v2775_v52, %v426_v14  ;;  %v2133_v31 = vpop.eup %2132 }
 0x1ed   :  { %v2886_v38 = vpop.f32.mrb[14].mxu1  ;;  %2062 = vmatprep.subr.bf16.mxu0 %v2061_v10  ;;  %2094 = vmatprep.subr.bf16.mxu1 %v2093_v46  ;;  %v405_v10 = vmul.f32 %v2131_v20, %v2586_v44  ;;  %v1199_v46 = vld [vmem:[%s3619_s6 + $0x50] sm:$0xff]  ;;  %v450_v54 = vadd.f32 %v2775_v52, %v427_v28  ;;  %2142 = vrsqrt.f32 %v365_v12  ;;  %v1234_v28 = vld [vmem:[%s3619_s6 + $0x168] sm:$0xff] }
 0x1ee   :  { %v2891_v3 = vpop.f32.mrb[15].mxu1  ;;  %624 = vmatmul.mubr.f32.gmra.mrb[20].mxu0 %v447_v58  ;;  %785 = vmatmul.mubr.f32.gmra.mrb[20].mxu1 %v447_v58  ;;  %v2075_v44 = vpack.c.bf16 %v1200_v16, %v1199_v46  ;;  %2144 = vrsqrt.f32 %v370_v57  ;;  %v1219_v46 = vld [vmem:[%s3619_s6 + $0xf0] sm:$0xff]  ;;  %v1220_v16 = vld [vmem:[%s3619_s6 + $0xf8] sm:$0xff] }
 0x1ef   :  { %629 = vmatprep.mubr.f32.mxu0 %v2294_v11  ;;  %790 = vmatprep.mubr.f32.mxu1 %v2294_v11  ;;  %v2135_v62 = vpop.eup %2134 }
 0x1f0   :  { %2064 = vmatpush3.bf16.msra.mxu0 %v2063_v2  ;;  %2096 = vmatpush3.bf16.msra.mxu1 %v2095_v34  ;;  %v428_v2 = vmul.f32 %v2769_v49, %v405_v10  ;;  %v406_v34 = vmul.f32 %v2133_v31, %v2583_v42  ;;  %v407_v42 = vmul.f32 %v2135_v62, %v2596_v48  ;;  %v2137_v36 = vpop.eup %2136  ;;  %v375_v48 = vadd.f32 1e-05, %v2891_v3  ;;  %v1251_v31 = vld [vmem:[%s3619_s6 + $0x1f0] sm:$0xff]  ;;  %v1236_v62 = vld [vmem:[%s3619_s6 + $0x178] sm:$0xff] }
 0x1f1   :  { %2066 = vmatprep.subr.bf16.mxu0 %v2065_v26  ;;  %2098 = vmatprep.subr.bf16.mxu1 %v2097_v0  ;;  %v408_v63 = vmul.f32 %v2137_v36, %v2593_v47  ;;  %v380_v47 = vadd.f32 1e-05, %v2886_v38  ;;  %v525_v36 = vld [vmem:[%s3622_s5] sm:$0xf] }
 0x1f2   :  { %630 = vmatmul.mubr.f32.gmra.mrb[22].mxu0 %v448_v15  ;;  %791 = vmatmul.mubr.f32.gmra.mrb[22].mxu1 %v448_v15  ;;  %v451_v58 = vadd.f32 %v2775_v52, %v428_v2  ;;  %v429_v60 = vmul.f32 %v2769_v49, %v406_v34  ;;  %v430_v61 = vmul.f32 %v2769_v49, %v407_v42  ;;  %2146 = vrsqrt.f32 %v375_v48  ;;  %v1235_v34 = vld [vmem:[%s3619_s6 + $0x170] sm:$0xff] }
 0x1f3   :  { %635 = vmatprep.mubr.f32.mxu0 %v2294_v11  ;;  %796 = vmatprep.mubr.f32.mxu1 %v2294_v11  ;;  %v2139_v39 = vpop.eup %2138  ;;  %v431_v26 = vmul.f32 %v2769_v49, %v408_v63  ;;  %2148 = vrsqrt.f32 %v380_v47  ;;  %v2115_v12 = vpack.c.bf16 %v1236_v62, %v1235_v34 }
 0x1f4   :  { %2068 = vmatpush3.bf16.msra.mxu0 %v2067_v8  ;;  %2100 = vmatpush3.bf16.msra.mxu1 %v2099_v9  ;;  %v452_v30 = vadd.f32 %v2775_v52, %v429_v60  ;;  %v453_v45 = vadd.f32 %v2775_v52, %v430_v61  ;;  %v409_v0 = vmul.f32 %v2139_v39, %v2606_v33  ;;  %v2141_v1 = vpop.eup %2140 }
 0x1f5   :  { %2070 = vmatprep.subr.bf16.mxu0 %v2069_v22  ;;  %2102 = vmatprep.subr.bf16.mxu1 %v2101_v23  ;;  %v454_v3 = vadd.f32 %v2775_v52, %v431_v26  ;;  %v410_v5 = vmul.f32 %v2141_v1, %v2603_v51  ;;  %v1232_v23 = vld [vmem:[%s3619_s6 + $0x158] sm:$0xff] }
 0x1f6   :  { %636 = vmatmul.mubr.f32.gmra.mrb[24].mxu0 %v449_v43  ;;  %797 = vmatmul.mubr.f32.gmra.mrb[24].mxu1 %v449_v43  ;;  %v432_v4 = vmul.f32 %v2769_v49, %v409_v0  ;;  %v1233_v43 = vld [vmem:[%s3619_s6 + $0x160] sm:$0xff] }
 0x1f7   :  { %641 = vmatprep.mubr.f32.mxu0 %v2294_v11  ;;  %802 = vmatprep.mubr.f32.mxu1 %v2294_v11  ;;  %v2143_v6 = vpop.eup %2142  ;;  %v433_v38 = vmul.f32 %v2769_v49, %v410_v5  ;;  %v2111_v10 = vpack.c.bf16 %v1234_v28, %v1233_v43 }
 0x1f8   :  { %2072 = vmatpush3.bf16.msra.mxu0 %v2071_v40  ;;  %2104 = vmatpush3.bf16.msra.mxu1 %v2103_v41  ;;  %v455_v33 = vadd.f32 %v2775_v52, %v432_v4  ;;  %v411_v7 = vmul.f32 %v2143_v6, %v2616_v35  ;;  %v2145_v8 = vpop.eup %2144  ;;  %v2079_v40 = vpack.c.bf16 %v1202_v27, %v1201_v25 }
 0x1f9   :  { %2074 = vmatprep.subr.bf16.mxu0 %v2073_v50  ;;  %2106 = vmatprep.subr.bf16.mxu1 %v2105_v32  ;;  %v456_v51 = vadd.f32 %v2775_v52, %v433_v38  ;;  %v412_v13 = vmul.f32 %v2145_v8, %v2613_v55  ;;  %v2081_v50 = vpack.c.bf16 %v1220_v16, %v1219_v46  ;;  %v1203_v32 = vld [vmem:[%s3619_s6 + $0x70] sm:$0xff] }
 0x1fa   :  { %642 = vmatmul.mubr.f32.gmra.mrb[26].mxu0 %v450_v54  ;;  %803 = vmatmul.mubr.f32.gmra.mrb[26].mxu1 %v450_v54  ;;  %v434_v9 = vmul.f32 %v2769_v49, %v411_v7  ;;  %v2083_v54 = vpack.c.bf16 %v1204_v53, %v1203_v32 }
 0x1fb   :  { %647 = vmatprep.mubr.f32.mxu0 %v2294_v11  ;;  %808 = vmatprep.mubr.f32.mxu1 %v2294_v11  ;;  %v435_v14 = vmul.f32 %v2769_v49, %v412_v13 }
 0x1fc   :  { %2076 = vmatpush3.bf16.msra.mxu0 %v2075_v44  ;;  %v2147_v15 = vpop.eup %2146  ;;  %v457_v35 = vadd.f32 %v2775_v52, %v434_v9  ;;  %v1252_v44 = vld [vmem:[%s3619_s6 + $0x1f8] sm:$0xff] }
 0x1fd   :  { %v413_v17 = vmul.f32 %v2147_v15, %v2626_v37  ;;  %v2149_v56 = vpop.eup %2148  ;;  %v458_v55 = vadd.f32 %v2775_v52, %v435_v14  ;;  %v2113_v2 = vpack.c.bf16 %v1252_v44, %v1251_v31 }
 0x1fe   :  { %648 = vmatmul.mubr.f32.gmra.mrb[28].mxu0 %v451_v58  ;;  %809 = vmatmul.mubr.f32.gmra.mrb[28].mxu1 %v451_v58  ;;  %v414_v19 = vmul.f32 %v2149_v56, %v2623_v59  ;;  %v1231_v59 = vld [vmem:[%s3619_s6 + $0x150] sm:$0xff]  ;;  %v527_v58 = vlaneseq }
 0x1ff   :  { %653 = vmatprep.mubr.f32.mxu0 %v2294_v11  ;;  %814 = vmatprep.mubr.f32.mxu1 %v2294_v11  ;;  %v436_v18 = vmul.f32 %v2769_v49, %v413_v17  ;;  %v2107_v21 = vpack.c.bf16 %v1232_v23, %v1231_v59 }
 0x200   :  { %v437_v20 = vmul.f32 %v2769_v49, %v414_v19  ;;  %v1217_v49 = vld [vmem:[%s3619_s6 + $0xe0] sm:$0xff]  ;;  %v528_v60 = vshrl.u32 %v527_v58, 7 }
 0x201   :  { %v459_v37 = vadd.f32 %v2775_v52, %v436_v18  ;;  %2108 = vmatpush3.bf16.msra.mxu1 %v2107_v21 }
 0x202   :  { %654 = vmatmul.mubr.f32.gmra.mrb[30].mxu0 %v452_v30  ;;  %815 = vmatmul.mubr.f32.gmra.mrb[30].mxu1 %v452_v30  ;;  %v460_v22 = vadd.f32 %v2775_v52, %v437_v20  ;;  %v1249_v52 = vld [vmem:[%s3619_s6 + $0x1e0] sm:$0xff]  ;;  %v529_v42 = vsub.s32 0, %v528_v60  ;;  %v537_v57 = vsub.s32 2, %v528_v60  ;;  %v533_v30 = vsub.s32 1, %v528_v60 }
 0x203   :  { %659 = vmatprep.mubr.f32.mxu0 %v2294_v11  ;;  %820 = vmatprep.mubr.f32.mxu1 %v2294_v11  ;;  %v2109_v41 = vpack.c.bf16 %v1250_v29, %v1249_v52  ;;  %v541_v61 = vsub.s32 3, %v528_v60 }
 0x204   :  { %v3058_v63 = vrot.slane %v525_v36, %v529_v42  ;;  %v3060_v39 = vrot.slane %v525_v36, %v537_v57  ;;  %v3062_v26 = vrot.slane %v525_v36, %v533_v30 }
 0x205   :  { %2110 = vmatprep.subr.bf16.mxu1 %v2109_v41  ;;  %v3064_v1 = vrot.slane %v525_v36, %v541_v61 }
 0x206   :  { %660 = vmatmul.mubr.f32.gmra.mrb[32].mxu0 %v453_v45  ;;  %821 = vmatmul.mubr.f32.gmra.mrb[32].mxu1 %v453_v45 }
 0x207   :  { %665 = vmatprep.mubr.f32.mxu0 %v2294_v11  ;;  %826 = vmatprep.mubr.f32.mxu1 %v2294_v11 }
 0x208   :  { %2112 = vmatpush3.bf16.msra.mxu1 %v2111_v10 }
 0x209   :  { %2114 = vmatprep.subr.bf16.mxu1 %v2113_v2 }
 0x20a   :  { %666 = vmatmul.mubr.f32.gmra.mrb[34].mxu0 %v454_v3  ;;  %827 = vmatmul.mubr.f32.gmra.mrb[34].mxu1 %v454_v3 }
 0x20b   :  { %671 = vmatprep.mubr.f32.mxu0 %v2294_v11  ;;  %832 = vmatprep.mubr.f32.mxu1 %v2294_v11 }
 0x20c   :  { %2116 = vmatpush3.bf16.msra.mxu1 %v2115_v12 }
 0x20e   :  { %672 = vmatmul.mubr.f32.gmra.mrb[36].mxu0 %v455_v33  ;;  %833 = vmatmul.mubr.f32.gmra.mrb[36].mxu1 %v455_v33 }
 0x20f   :  { %677 = vmatprep.mubr.f32.mxu0 %v2294_v11  ;;  %838 = vmatprep.mubr.f32.mxu1 %v2294_v11 }
 0x212   :  { %678 = vmatmul.mubr.f32.gmra.mrb[38].mxu0 %v456_v51  ;;  %839 = vmatmul.mubr.f32.gmra.mrb[38].mxu1 %v456_v51 }
 0x213   :  { %683 = vmatprep.mubr.f32.mxu0 %v2294_v11  ;;  %844 = vmatprep.mubr.f32.mxu1 %v2294_v11 }
 0x216   :  { %684 = vmatmul.mubr.f32.gmra.mrb[40].mxu0 %v457_v35  ;;  %845 = vmatmul.mubr.f32.gmra.mrb[40].mxu1 %v457_v35 }
 0x217   :  { %689 = vmatprep.mubr.f32.mxu0 %v2294_v11  ;;  %850 = vmatprep.mubr.f32.mxu1 %v2294_v11 }
 0x21a   :  { %690 = vmatmul.mubr.f32.gmra.mrb[42].mxu0 %v458_v55  ;;  %851 = vmatmul.mubr.f32.gmra.mrb[42].mxu1 %v458_v55 }
 0x21b   :  { %695 = vmatprep.mubr.f32.mxu0 %v2294_v11  ;;  %856 = vmatprep.mubr.f32.mxu1 %v2294_v11 }
 0x21e   :  { %696 = vmatmul.mubr.f32.gmra.mrb[44].mxu0 %v459_v37  ;;  %857 = vmatmul.mubr.f32.gmra.mrb[44].mxu1 %v459_v37 }
 0x21f   :  { %701 = vmatprep.mubr.f32.mxu0 %v2294_v11  ;;  %862 = vmatprep.mubr.f32.mxu1 %v2294_v11  ;;  %v1218_v11 = vld [vmem:[%s3619_s6 + $0xe8] sm:$0xff] }
 0x220   :  { %v2077_v24 = vpack.c.bf16 %v1218_v11, %v1217_v49 }
 0x222   :  { %702 = vmatmul.mubr.f32.gmra.mrb[46].mxu0 %v460_v22  ;;  %863 = vmatmul.mubr.f32.gmra.mrb[46].mxu1 %v460_v22 }
 0x223   :  { %2078 = vmatprep.subr.bf16.mxu0 %v2077_v24 }
 0x224   :  { %2080 = vmatpush3.bf16.msra.mxu0 %v2079_v40 }
 0x225   :  { %2082 = vmatprep.subr.bf16.mxu0 %v2081_v50 }
 0x228   :  { %2084 = vmatpush3.bf16.msra.mxu0 %v2083_v54 }
 0x2b9   :  { %v613_v48 = vpop.f32.mrb[16].mxu0  ;;  %v774_v45 = vpop.f32.mrb[16].mxu1 }
 0x2ba   :  { %v615_v0 = vpop.f32.mrb[17].mxu0  ;;  %v776_v47 = vpop.f32.mrb[17].mxu1  ;;  %v614_v3 = vadd.f32 %v613_v48, %v3058_v63  ;;  %v775_v4 = vadd.f32 %v774_v45, %v3060_v39 }
 0x2bb   :  { %v616_v5 = vadd.f32 %v615_v0, %v3062_v26  ;;  %v777_v6 = vadd.f32 %v776_v47, %v3064_v1 }
 0x2bc   :  { %v933_v7 = vmul.f32 0.70710677, %v614_v3  ;;  %v935_v9 = vmul.f32 0.70710677, %v775_v4  ;;  %v3077_v27 = vmul.f32 0.5, %v614_v3  ;;  %v3079_v29 = vmul.f32 0.5, %v775_v4 }
 0x2bd   :  { %v619_v33 = vpop.f32.mrb[18].mxu0  ;;  %v780_v38 = vpop.f32.mrb[18].mxu1  ;;  %v934_v13 = vmul.f32 0.70710677, %v616_v5  ;;  %v936_v17 = vmul.f32 0.70710677, %v777_v6 }
 0x2be   :  { %v621_v8 = vpop.f32.mrb[19].mxu0  ;;  %v782_v51 = vpop.f32.mrb[19].mxu1  ;;  %v620_v15 = vadd.f32 %v619_v33, %v3058_v63  ;;  %v781_v56 = vadd.f32 %v780_v38, %v3060_v39  ;;  %2150 = verf.f32 %v933_v7  ;;  %v3081_v40 = vmul.f32 0.5, %v616_v5 }
 0x2bf   :  { %v622_v55 = vadd.f32 %v621_v8, %v3062_v26  ;;  %2152 = verf.f32 %v935_v9  ;;  %v783_v37 = vadd.f32 %v782_v51, %v3064_v1  ;;  %v3083_v43 = vmul.f32 0.5, %v777_v6 }
 0x2c0   :  { %2154 = verf.f32 %v934_v13  ;;  %v937_v20 = vmul.f32 0.70710677, %v620_v15  ;;  %v939_v21 = vmul.f32 0.70710677, %v781_v56  ;;  %v3086_v31 = vmul.f32 0.5, %v620_v15 }
 0x2c1   :  { %v625_v35 = vpop.f32.mrb[20].mxu0  ;;  %v786_v14 = vpop.f32.mrb[20].mxu1  ;;  %2156 = verf.f32 %v936_v17  ;;  %v938_v52 = vmul.f32 0.70710677, %v622_v55  ;;  %v940_v41 = vmul.f32 0.70710677, %v783_v37 }
 0x2c2   :  { %v627_v18 = vpop.f32.mrb[21].mxu0  ;;  %v788_v19 = vpop.f32.mrb[21].mxu1  ;;  %v626_v22 = vadd.f32 %v625_v35, %v3058_v63  ;;  %v787_v49 = vadd.f32 %v786_v14, %v3060_v39  ;;  %2158 = verf.f32 %v937_v20  ;;  %v3089_v54 = vmul.f32 0.5, %v781_v56 }
 0x2c3   :  { %v628_v24 = vadd.f32 %v627_v18, %v3062_v26  ;;  %v789_v10 = vadd.f32 %v788_v19, %v3064_v1  ;;  %2160 = verf.f32 %v939_v21  ;;  %v3092_v62 = vmul.f32 0.5, %v622_v55 }
 0x2c4   :  { %v941_v28 = vmul.f32 0.70710677, %v626_v22  ;;  %v943_v50 = vmul.f32 0.70710677, %v787_v49  ;;  %2162 = verf.f32 %v938_v52  ;;  %v3094_v12 = vmul.f32 0.5, %v783_v37 }
 0x2c5   :  { %v631_v59 = vpop.f32.mrb[22].mxu0  ;;  %v792_v23 = vpop.f32.mrb[22].mxu1  ;;  %v942_v2 = vmul.f32 0.70710677, %v628_v24  ;;  %2164 = verf.f32 %v940_v41  ;;  %v3097_v42 = vmul.f32 0.5, %v626_v22  ;;  %v3100_v45 = vmul.f32 0.5, %v787_v49 }
 0x2c6   :  { %v633_v11 = vpop.f32.mrb[23].mxu0  ;;  %v794_v25 = vpop.f32.mrb[23].mxu1  ;;  %v632_v32 = vadd.f32 %v631_v59, %v3058_v63  ;;  %v793_v34 = vadd.f32 %v792_v23, %v3060_v39  ;;  %2166 = verf.f32 %v941_v28  ;;  %v944_v36 = vmul.f32 0.70710677, %v789_v10 }
 0x2c7   :  { %v634_v58 = vadd.f32 %v633_v11, %v3062_v26  ;;  %v795_v57 = vadd.f32 %v794_v25, %v3064_v1  ;;  %2168 = verf.f32 %v943_v50  ;;  %v3105_v6 = vmul.f32 0.5, %v628_v24 }
 0x2c8   :  { %v2151_v60 = vpop.eup %2150  ;;  %v945_v0 = vmul.f32 0.70710677, %v632_v32  ;;  %2170 = verf.f32 %v942_v2  ;;  %v3107_v33 = vmul.f32 0.5, %v789_v10  ;;  %v947_v38 = vmul.f32 0.70710677, %v793_v34 }
 0x2c9   :  { %v637_v46 = vpop.f32.mrb[24].mxu0  ;;  %v798_v16 = vpop.f32.mrb[24].mxu1  ;;  %v1061_v8 = vadd.f32 1.0, %v2151_v60  ;;  %v3109_v51 = vmul.f32 0.5, %v632_v32  ;;  %v946_v9 = vmul.f32 0.70710677, %v634_v58  ;;  %2172 = verf.f32 %v944_v36 }
 0x2ca   :  { %v639_v53 = vpop.f32.mrb[25].mxu0  ;;  %v800_v44 = vpop.f32.mrb[25].mxu1  ;;  %v3103_v47 = vadd.f32 %v637_v46, %v3058_v63  ;;  %v799_v13 = vadd.f32 %v798_v16, %v3060_v39  ;;  %v948_v35 = vmul.f32 0.70710677, %v795_v57  ;;  %2174 = verf.f32 %v945_v0 }
 0x2cb   :  { %v2153_v48 = vpop.eup %2152  ;;  %v640_v14 = vadd.f32 %v639_v53, %v3062_v26  ;;  %v3113_v55 = vmul.f32 0.5, %v793_v34  ;;  %v801_v19 = vadd.f32 %v800_v44, %v3064_v1  ;;  %2176 = verf.f32 %v947_v38 }
 0x2cc   :  { %v2155_v5 = vpop.eup %2154  ;;  %v1063_v15 = vadd.f32 1.0, %v2153_v48  ;;  %v949_v18 = vmul.f32 0.70710677, %v3103_v47  ;;  %v1125_v11 = vmul.f32 %v1061_v8, %v3077_v27  ;;  %v3123_v52 = vmul.f32 0.5, %v634_v58 }
 0x2cd   :  { %v643_v30 = vpop.f32.mrb[26].mxu0  ;;  %v804_v61 = vpop.f32.mrb[26].mxu1  ;;  %v1062_v59 = vadd.f32 1.0, %v2155_v5  ;;  %2178 = verf.f32 %v946_v9  ;;  %v951_v24 = vmul.f32 0.70710677, %v799_v13  ;;  %v3131_v32 = vmul.f32 0.5, %v795_v57 }
 0x2ce   :  { %v645_v3 = vpop.f32.mrb[27].mxu0  ;;  %v806_v4 = vpop.f32.mrb[27].mxu1  ;;  %v3120_v21 = vadd.f32 %v643_v30, %v3058_v63  ;;  %v1127_v41 = vmul.f32 %v1063_v15, %v3079_v29  ;;  %2180 = verf.f32 %v948_v35  ;;  %v950_v28 = vmul.f32 0.70710677, %v640_v14 }
 0x2cf   :  { %v2157_v7 = vpop.eup %2156  ;;  %v3127_v10 = vadd.f32 %v804_v61, %v3060_v39  ;;  %2182 = verf.f32 %v949_v18  ;;  %v952_v27 = vmul.f32 0.70710677, %v801_v19  ;;  %v3139_v34 = vadd.f32 %v645_v3, %v3062_v26 }
 0x2d0   :  { %v2159_v22 = vpop.eup %2158  ;;  %v1064_v23 = vadd.f32 1.0, %v2157_v7  ;;  %v953_v29 = vmul.f32 0.70710677, %v3120_v21  ;;  %v1126_v58 = vmul.f32 %v1062_v59, %v3081_v40  ;;  %2184 = verf.f32 %v951_v24 }
 0x2d1   :  { %v649_v17 = vpop.f32.mrb[28].mxu0  ;;  %v810_v56 = vpop.f32.mrb[28].mxu1  ;;  %v1065_v50 = vadd.f32 1.0, %v2159_v22  ;;  %v3146_v48 = vadd.f32 %v806_v4, %v3064_v1  ;;  %2186 = verf.f32 %v950_v28  ;;  %v955_v38 = vmul.f32 0.70710677, %v3127_v10 }
 0x2d2   :  { %v651_v37 = vpop.f32.mrb[29].mxu0  ;;  %v3117_v20 = vpop.f32.mrb[29].mxu1  ;;  %v1128_v60 = vmul.f32 %v1064_v23, %v3083_v43  ;;  %1324 = vmatprep.mubr.f32.mxu0 %v1126_v58  ;;  %v650_v40 = vadd.f32 %v649_v17, %v3058_v63  ;;  %v3155_v7 = vmul.f32 0.5, %v3103_v47  ;;  %v3157_v8 = vmul.f32 0.5, %v799_v13 }
 0x2d3   :  { %v2161_v49 = vpop.eup %2160  ;;  %2188 = verf.f32 %v952_v27  ;;  %1325 = vmatmul.mubr.f32.vlgmr.msra.gmra.mrb[48].mxu0 %v1125_v11  ;;  %v3160_v4 = vadd.f32 %v810_v56, %v3060_v39  ;;  %v3166_v17 = vmul.f32 0.5, %v640_v14  ;;  %v3168_v18 = vmul.f32 0.5, %v801_v19 }
 0x2d4   :  { %v2163_v25 = vpop.eup %2162  ;;  %v1067_v30 = vadd.f32 1.0, %v2161_v49  ;;  %1469 = vmatprep.mubr.f32.mxu1 %v1128_v60  ;;  %2190 = verf.f32 %v953_v29  ;;  %v954_v47 = vmul.f32 0.70710677, %v3139_v34  ;;  %v956_v23 = vmul.f32 0.70710677, %v3146_v48 }
 0x2d5   :  { %v3129_v46 = vpop.f32.mrb[30].mxu0  ;;  %v2165_v16 = vpop.eup %2164  ;;  %v1066_v61 = vadd.f32 1.0, %v2163_v25  ;;  %1470 = vmatmul.mubr.f32.vlgmr.msra.gmra.mrb[48].mxu1 %v1127_v41  ;;  %v652_v56 = vadd.f32 %v651_v37, %v3062_v26  ;;  %2192 = verf.f32 %v955_v38  ;;  %v957_v11 = vmul.f32 0.70710677, %v650_v40 }
 0x2d6   :  { %v3133_v53 = vpop.f32.mrb[30].mxu1  ;;  %v3135_v44 = vpop.f32.mrb[31].mxu0  ;;  %v1068_v5 = vadd.f32 1.0, %v2165_v16  ;;  %v959_v28 = vmul.f32 0.70710677, %v3160_v4  ;;  %v813_v16 = vadd.f32 %v3117_v20, %v3064_v1  ;;  %v1129_v27 = vmul.f32 %v1065_v50, %v3086_v31 }
 0x2d7   :  { %v2167_v2 = vpop.eup %2166  ;;  %v3143_v36 = vpop.f32.mrb[31].mxu1  ;;  %v1130_v24 = vmul.f32 %v1066_v61, %v3092_v62  ;;  %v1131_v37 = vmul.f32 %v1067_v30, %v3089_v54  ;;  %v3189_v60 = vmul.f32 0.5, %v3120_v21  ;;  %2194 = verf.f32 %v954_v47 }
 0x2d8   :  { %v2169_v57 = vpop.eup %2168  ;;  %v1069_v22 = vadd.f32 1.0, %v2167_v2  ;;  %v1132_v14 = vmul.f32 %v1068_v5, %v3094_v12  ;;  %v3192_v20 = vmul.f32 0.5, %v3127_v10  ;;  %2196 = verf.f32 %v956_v23 }
 0x2d9   :  { %v2171_v0 = vpop.eup %2170  ;;  %v3150_v3 = vpop.f32.mrb[32].mxu0  ;;  %v1071_v12 = vadd.f32 1.0, %v2169_v57  ;;  %1329 = vmatprep.mubr.f32.mxu0 %v1130_v24  ;;  %v958_v31 = vmul.f32 0.70710677, %v652_v56  ;;  %v3196_v57 = vmul.f32 0.5, %v3139_v34  ;;  %2198 = verf.f32 %v957_v11 }
 0x2da   :  { %v3152_v43 = vpop.f32.mrb[32].mxu1  ;;  %v3162_v9 = vpop.f32.mrb[33].mxu0  ;;  %v1070_v59 = vadd.f32 1.0, %v2171_v0  ;;  %1474 = vmatprep.mubr.f32.mxu1 %v1132_v14  ;;  %1330 = vmatmul.mubr.f32.gmra.mrb[50].mxu0 %v1129_v27  ;;  %v656_v21 = vadd.f32 %v3129_v46, %v3058_v63  ;;  %2200 = verf.f32 %v959_v28  ;;  %v960_v38 = vmul.f32 0.70710677, %v813_v16 }
 0x2db   :  { %v3164_v15 = vpop.f32.mrb[33].mxu1  ;;  %v2173_v35 = vpop.eup %2172  ;;  %1475 = vmatmul.mubr.f32.gmra.mrb[50].mxu1 %v1131_v37  ;;  %v817_v34 = vadd.f32 %v3133_v53, %v3060_v39  ;;  %2202 = verf.f32 %v958_v31  ;;  %v1133_v24 = vmul.f32 %v1069_v22, %v3097_v42  ;;  %v3220_v14 = vmul.f32 0.5, %v3160_v4 }
 0x2dc   :  { %v2175_v13 = vpop.eup %2174  ;;  %v1072_v58 = vadd.f32 1.0, %v2173_v35  ;;  %v1134_v54 = vmul.f32 %v1070_v59, %v3105_v6  ;;  %v3203_v6 = vmul.f32 0.5, %v3146_v48  ;;  %v961_v53 = vmul.f32 0.70710677, %v656_v21 }
 0x2dd   :  { %v2177_v49 = vpop.eup %2176  ;;  %v3175_v25 = vpop.f32.mrb[34].mxu0  ;;  %v1073_v50 = vadd.f32 1.0, %v2175_v13  ;;  %v3205_v13 = vmul.f32 0.5, %v650_v40  ;;  %v1135_v28 = vmul.f32 %v1071_v12, %v3100_v45  ;;  %2204 = verf.f32 %v960_v38 }
 0x2de   :  { %v3177_v19 = vpop.f32.mrb[34].mxu1  ;;  %v2179_v41 = vpop.eup %2178  ;;  %v1075_v5 = vadd.f32 1.0, %v2177_v49  ;;  %1334 = vmatprep.mubr.f32.mxu0 %v1134_v54  ;;  %v658_v49 = vadd.f32 %v3135_v44, %v3062_v26  ;;  %v1136_v11 = vmul.f32 %v1072_v58, %v3107_v33  ;;  %v3231_v33 = vmul.f32 0.5, %v652_v56 }
 0x2df   :  { %v3184_v2 = vpop.f32.mrb[35].mxu0  ;;  %v3186_v29 = vpop.f32.mrb[35].mxu1  ;;  %v1074_v10 = vadd.f32 1.0, %v2179_v41  ;;  %v819_v41 = vadd.f32 %v3143_v36, %v3064_v1  ;;  %1335 = vmatmul.mubr.f32.gmra.mrb[52].mxu0 %v1133_v24  ;;  %v3238_v12 = vmul.f32 0.5, %v813_v16  ;;  %v963_v58 = vmul.f32 0.70710677, %v817_v34 }
 0x2e0   :  { %v2181_v62 = vpop.eup %2180  ;;  %1479 = vmatprep.mubr.f32.mxu1 %v1136_v11  ;;  %v3242_v56 = vmul.f32 0.5, %v656_v21  ;;  %v962_v54 = vmul.f32 0.70710677, %v658_v49  ;;  %2206 = verf.f32 %v961_v53  ;;  %v823_v21 = vadd.f32 %v3152_v43, %v3060_v39 }
 0x2e1   :  { %v2183_v61 = vpop.eup %2182  ;;  %v3200_v30 = vpop.f32.mrb[36].mxu0  ;;  %v1076_v47 = vadd.f32 1.0, %v2181_v62  ;;  %v1138_v42 = vmul.f32 %v1074_v10, %v3123_v52  ;;  %1480 = vmatmul.mubr.f32.gmra.mrb[52].mxu1 %v1135_v28  ;;  %v3244_v52 = vmul.f32 0.5, %v817_v34  ;;  %v964_v10 = vmul.f32 0.70710677, %v819_v41 }
 0x2e2   :  { %v2185_v0 = vpop.eup %2184  ;;  %v3209_v59 = vpop.f32.mrb[36].mxu1  ;;  %v3229_v44 = vadd.f32 1.0, %v2183_v61  ;;  %2208 = verf.f32 %v963_v58  ;;  %v967_v58 = vmul.f32 0.70710677, %v823_v21 }
 0x2e3   :  { %v2187_v35 = vpop.eup %2186  ;;  %v3211_v46 = vpop.f32.mrb[37].mxu0  ;;  %v1079_v62 = vadd.f32 1.0, %v2185_v0  ;;  %1339 = vmatprep.mubr.f32.mxu0 %v1138_v42  ;;  %3625 = vst [vmem:[#allocation2_spill] sm:$0xff] %v3244_v52  ;;  %v662_v0 = vadd.f32 %v3150_v3, %v3058_v63  ;;  %v1140_v24 = vmul.f32 %v1076_v47, %v3131_v32  ;;  %v3262_v3 = vmul.f32 0.5, %v658_v49 }
 0x2e4   :  { %v2189_v23 = vpop.eup %2188  ;;  %v3217_v48 = vpop.f32.mrb[37].mxu1  ;;  %v1078_v45 = vadd.f32 1.0, %v2187_v35  ;;  %v664_v42 = vadd.f32 %v3162_v9, %v3062_v26  ;;  %2210 = verf.f32 %v962_v54  ;;  %v825_v32 = vadd.f32 %v3164_v15, %v3064_v1 }
 0x2e5   :  { %v2191_v40 = vpop.eup %2190  ;;  %v3225_v27 = vpop.f32.mrb[38].mxu0  ;;  %v1080_v61 = vadd.f32 1.0, %v2189_v23  ;;  %1484 = vmatprep.mubr.f32.mxu1 %v1140_v24  ;;  %2212 = verf.f32 %v964_v10  ;;  %v965_v47 = vmul.f32 0.70710677, %v662_v0  ;;  %v1141_v24 = vmul.f32 %v3229_v44, %v3155_v7 }
 0x2e6   :  { %v3227_v37 = vpop.f32.mrb[38].mxu1  ;;  %v3234_v4 = vpop.f32.mrb[39].mxu0  ;;  %v3240_v31 = vadd.f32 1.0, %v2191_v40  ;;  %v1137_v40 = vmul.f32 %v1073_v50, %v3109_v51  ;;  %v1142_v51 = vmul.f32 %v1078_v45, %v3166_v17  ;;  %v3270_v50 = vmul.f32 0.5, %v819_v41 }
 0x2e7   :  { %v3236_v22 = vpop.f32.mrb[39].mxu1  ;;  %v2193_v36 = vpop.eup %2192  ;;  %v966_v17 = vmul.f32 0.70710677, %v664_v42  ;;  %v668_v41 = vadd.f32 %v3175_v25, %v3058_v63  ;;  %v1144_v45 = vmul.f32 %v1080_v61, %v3168_v18  ;;  %2214 = verf.f32 %v965_v47 }
 0x2e8   :  { %v2195_v38 = vpop.eup %2194  ;;  %v3252_v23 = vadd.f32 1.0, %v2193_v36  ;;  %v1139_v36 = vmul.f32 %v1075_v5, %v3113_v55  ;;  %1340 = vmatmul.mubr.f32.gmra.mrb[54].mxu0 %v1137_v40  ;;  %v3274_v55 = vmul.f32 0.5, %v662_v0  ;;  %v3276_v5 = vmul.f32 0.5, %v823_v21 }
 0x2e9   :  { %v3248_v35 = vpop.f32.mrb[40].mxu0  ;;  %v3250_v16 = vpop.f32.mrb[40].mxu1  ;;  %v1082_v52 = vadd.f32 1.0, %v2195_v38  ;;  %1344 = vmatprep.mubr.f32.mxu0 %v1142_v51  ;;  %v829_v21 = vadd.f32 %v3177_v19, %v3060_v39  ;;  %v3296_v25 = vmul.f32 0.5, %v664_v42  ;;  %v670_v18 = vadd.f32 %v3184_v2, %v3062_v26 }
 0x2ea   :  { %3626 = vst [vmem:[#allocation3_spill] sm:$0xff] %v3250_v16  ;;  %v2197_v11 = vpop.eup %2196  ;;  %v3258_v34 = vpop.f32.mrb[41].mxu0  ;;  %1485 = vmatmul.mubr.f32.gmra.mrb[54].mxu1 %v1139_v36  ;;  %2216 = verf.f32 %v967_v58  ;;  %v3304_v19 = vmul.f32 0.5, %v825_v32  ;;  %v831_v7 = vadd.f32 %v3186_v29, %v3064_v1  ;;  %v969_v51 = vmul.f32 0.70710677, %v668_v41 }
 0x2eb   :  { %v3260_v53 = vpop.f32.mrb[41].mxu1  ;;  %v2199_v28 = vpop.eup %2198  ;;  %v1084_v43 = vadd.f32 1.0, %v2197_v11  ;;  %v968_v11 = vmul.f32 0.70710677, %v825_v32  ;;  %1489 = vmatprep.mubr.f32.mxu1 %v1144_v45  ;;  %2218 = verf.f32 %v966_v17  ;;  %v674_v47 = vadd.f32 %v3200_v30, %v3058_v63 }
 0x2ec   :  { %v2201_v16 = vpop.eup %2200  ;;  %v3272_v9 = vadd.f32 1.0, %v2199_v28  ;;  %1345 = vmatmul.mubr.f32.gmra.mrb[56].mxu0 %v1141_v24  ;;  %v3315_v32 = vmul.f32 0.5, %v668_v41  ;;  %v835_v29 = vadd.f32 %v3209_v59, %v3060_v39  ;;  %v970_v58 = vmul.f32 0.70710677, %v670_v18 }
 0x2ed   :  { %v2203_v49 = vpop.eup %2202  ;;  %v3278_v15 = vpop.f32.mrb[42].mxu0  ;;  %v3280_v54 = vadd.f32 1.0, %v2201_v16  ;;  %v1143_v16 = vmul.f32 %v1079_v62, %v3157_v8  ;;  %v1146_v8 = vmul.f32 %v1082_v52, %v3196_v57  ;;  %2220 = verf.f32 %v968_v11 }
 0x2ee   :  { %v3285_v38 = vpop.f32.mrb[42].mxu1  ;;  %v3287_v10 = vpop.f32.mrb[43].mxu0  ;;  %v1086_v28 = vadd.f32 1.0, %v2203_v49  ;;  %v971_v49 = vmul.f32 0.70710677, %v829_v21  ;;  %v3319_v52 = vmul.f32 0.5, %v829_v21  ;;  %v676_v45 = vadd.f32 %v3211_v46, %v3062_v26 }
 0x2ef   :  { %v2205_v0 = vpop.eup %2204  ;;  %v3294_v40 = vpop.f32.mrb[43].mxu1  ;;  %1490 = vmatmul.mubr.f32.gmra.mrb[56].mxu1 %v1143_v16  ;;  %1349 = vmatprep.mubr.f32.mxu0 %v1146_v8  ;;  %v1148_v17 = vmul.f32 %v1084_v43, %v3203_v6  ;;  %v972_v24 = vmul.f32 0.70710677, %v831_v7  ;;  %v1145_v59 = vmul.f32 %v3240_v31, %v3189_v60  ;;  %v1147_v21 = vmul.f32 %v3252_v23, %v3192_v20 }
 0x2f0   :  { %v2207_v2 = vpop.eup %2206  ;;  %v1088_v42 = vadd.f32 1.0, %v2205_v0  ;;  %2222 = verf.f32 %v969_v51  ;;  %v3338_v6 = vmul.f32 0.5, %v670_v18  ;;  %v973_v43 = vmul.f32 0.70710677, %v674_v47 }
 0x2f1   :  { %v3300_v61 = vpop.f32.mrb[44].mxu0  ;;  %v3302_v36 = vpop.f32.mrb[44].mxu1  ;;  %v3328_v11 = vadd.f32 1.0, %v2207_v2  ;;  %v3342_v2 = vadd.f32 %v3217_v48, %v3064_v1  ;;  %1494 = vmatprep.mubr.f32.mxu1 %v1148_v17  ;;  %2224 = verf.f32 %v971_v49  ;;  %1350 = vmatmul.mubr.f32.gmra.mrb[58].mxu0 %v1145_v59  ;;  %v3346_v60 = vadd.f32 %v3225_v27, %v3058_v63 }
 0x2f2   :  { %v3309_v44 = vpop.f32.mrb[45].mxu0  ;;  %v3311_v62 = vpop.f32.mrb[45].mxu1  ;;  %v1150_v20 = vmul.f32 %v1086_v28, %v3231_v33  ;;  %2226 = verf.f32 %v970_v58  ;;  %v3349_v31 = vmul.f32 0.5, %v831_v7  ;;  %v974_v23 = vmul.f32 0.70710677, %v676_v45 }
 0x2f3   :  { %v2209_v57 = vpop.eup %2208  ;;  %1495 = vmatmul.mubr.f32.gmra.mrb[58].mxu1 %v1147_v21  ;;  %v3353_v18 = vadd.f32 %v3227_v37, %v3060_v39  ;;  %2228 = verf.f32 %v972_v24  ;;  %v3357_v49 = vadd.f32 %v3234_v4, %v3062_v26  ;;  %v976_v33 = vmul.f32 0.70710677, %v3342_v2 }
 0x2f4   :  { %v2211_v41 = vpop.eup %2210  ;;  %v1091_v48 = vadd.f32 1.0, %v2209_v57  ;;  %1354 = vmatprep.mubr.f32.mxu0 %v1150_v20  ;;  %2230 = verf.f32 %v973_v43  ;;  %v3362_v28 = vadd.f32 %v3236_v22, %v3064_v1  ;;  %v1152_v7 = vmul.f32 %v1088_v42, %v3238_v12 }
 0x2f5   :  { %v3324_v0 = vpop.f32.mrb[46].mxu0  ;;  %v3326_v30 = vpop.f32.mrb[46].mxu1  ;;  %v1090_v51 = vadd.f32 1.0, %v2211_v41  ;;  %v977_v57 = vmul.f32 0.70710677, %v3346_v60  ;;  %v1149_v58 = vmul.f32 %v3272_v9, %v3205_v13  ;;  %v1151_v4 = vmul.f32 %v3280_v54, %v3220_v14 }
 0x2f6   :  { %3627 = vst [vmem:[#allocation4_spill] sm:$0xff] %v3326_v30  ;;  %v3334_v16 = vpop.f32.mrb[47].mxu0  ;;  %v3336_v8 = vpop.f32.mrb[47].mxu1  ;;  %v975_v30 = vmul.f32 0.70710677, %v835_v29  ;;  %v3370_v24 = vmul.f32 0.5, %v674_v47  ;;  %1499 = vmatprep.mubr.f32.mxu1 %v1152_v7  ;;  %v3376_v42 = vadd.f32 %v3258_v34, %v3062_v26  ;;  %v3380_v13 = vadd.f32 %v3260_v53, %v3064_v1 }
 0x2f7   :  { %v2213_v46 = vpop.eup %2212  ;;  %v979_v22 = vmul.f32 0.70710677, %v3353_v18  ;;  %v978_v12 = vmul.f32 0.70710677, %v3357_v49  ;;  %1355 = vmatmul.mubr.f32.gmra.mrb[60].mxu0 %v1149_v58  ;;  %1500 = vmatmul.mubr.f32.gmra.mrb[60].mxu1 %v1151_v4  ;;  %v1154_v14 = vmul.f32 %v1090_v51, %v3262_v3  ;;  %v3383_v54 = vmul.f32 0.5, %v835_v29 }
 0x2f8   :  { %v2215_v27 = vpop.eup %2214  ;;  %2232 = verf.f32 %v975_v30  ;;  %v1092_v41 = vadd.f32 1.0, %v2213_v46  ;;  %v980_v47 = vmul.f32 0.70710677, %v3362_v28  ;;  %v3386_v21 = vmul.f32 0.5, %v676_v45 }
 0x2f9   :  { %v2217_v37 = vpop.eup %2216  ;;  %2234 = verf.f32 %v974_v23  ;;  %v1093_v9 = vadd.f32 1.0, %v2215_v27  ;;  %v3390_v34 = vadd.f32 %v3248_v35, %v3058_v63  ;;  %1359 = vmatprep.mubr.f32.mxu0 %v1154_v14  ;;  %v982_v3 = vmul.f32 0.70710677, %v3376_v42  ;;  %v3628_v23 = vld [vmem:[#allocation2_spill] sm:$0xff] }
 0x2fa   :  { %v2219_v17 = vpop.eup %2218  ;;  %2236 = verf.f32 %v976_v33  ;;  %v1095_v53 = vadd.f32 1.0, %v2217_v37  ;;  %v1156_v29 = vmul.f32 %v1092_v41, %v3270_v50  ;;  %v984_v20 = vmul.f32 0.70710677, %v3380_v13  ;;  %v3629_v33 = vld [vmem:[#allocation3_spill] sm:$0xff] }
 0x2fb   :  { %v2221_v59 = vpop.eup %2220  ;;  %v1094_v30 = vadd.f32 1.0, %v2219_v17  ;;  %2238 = verf.f32 %v977_v57  ;;  %v1153_v45 = vmul.f32 %v3328_v11, %v3242_v56  ;;  %v1155_v51 = vmul.f32 %v1091_v48, %v3628_v23 }
 0x2fc   :  { %v2223_v46 = vpop.eup %2222  ;;  %2240 = verf.f32 %v979_v22  ;;  %v1096_v35 = vadd.f32 1.0, %v2221_v59  ;;  %v3400_v7 = vadd.f32 %v3629_v33, %v3060_v39  ;;  %1504 = vmatprep.mubr.f32.mxu1 %v1156_v29  ;;  %v3404_v50 = vadd.f32 %v3278_v15, %v3058_v63 }
 0x2fd   :  { %v2225_v43 = vpop.eup %2224  ;;  %2242 = verf.f32 %v978_v12  ;;  %v981_v57 = vmul.f32 0.70710677, %v3390_v34  ;;  %1360 = vmatmul.mubr.f32.gmra.mrb[62].mxu0 %v1153_v45  ;;  %1505 = vmatmul.mubr.f32.gmra.mrb[62].mxu1 %v1155_v51  ;;  %v3409_v56 = vadd.f32 %v3287_v10, %v3062_v26  ;;  %v3413_v11 = vadd.f32 %v3294_v40, %v3064_v1 }
 0x2fe   :  { %v2227_v27 = vpop.eup %2226  ;;  %2244 = verf.f32 %v980_v47  ;;  %v1158_v48 = vmul.f32 %v1094_v30, %v3296_v25  ;;  %v1097_v4 = vadd.f32 1.0, %v2223_v46  ;;  %v3417_v15 = vmul.f32 0.5, %v3342_v2 }
 0x2ff   :  { %v2229_v37 = vpop.eup %2228  ;;  %2246 = verf.f32 %v982_v3  ;;  %v3421_v17 = vadd.f32 %v3285_v38, %v3060_v39  ;;  %v1099_v22 = vadd.f32 1.0, %v2225_v43  ;;  %v1098_v10 = vadd.f32 1.0, %v2227_v27 }
 0x300   :  { %v2231_v58 = vpop.eup %2230  ;;  %2248 = verf.f32 %v984_v20  ;;  %v986_v59 = vmul.f32 0.70710677, %v3409_v56  ;;  %1364 = vmatprep.mubr.f32.mxu0 %v1158_v48  ;;  %v1100_v12 = vadd.f32 1.0, %v2229_v37  ;;  %v983_v25 = vmul.f32 0.70710677, %v3400_v7 }
 0x301   :  { %v988_v14 = vmul.f32 0.70710677, %v3413_v11  ;;  %v1160_v2 = vmul.f32 %v1096_v35, %v3304_v19  ;;  %2250 = verf.f32 %v981_v57  ;;  %v985_v47 = vmul.f32 0.70710677, %v3404_v50 }
 0x302   :  { %v2233_v41 = vpop.eup %2232  ;;  %v1157_v38 = vmul.f32 %v1093_v9, %v3274_v55  ;;  %v1159_v30 = vmul.f32 %v1095_v53, %v3276_v5  ;;  %v987_v3 = vmul.f32 0.70710677, %v3421_v17  ;;  %2252 = verf.f32 %v986_v59 }
 0x303   :  { %v2235_v40 = vpop.eup %2234  ;;  %1509 = vmatprep.mubr.f32.mxu1 %v1160_v2  ;;  %v3433_v29 = vadd.f32 %v3300_v61, %v3058_v63  ;;  %v3437_v43 = vadd.f32 %v3302_v36, %v3060_v39  ;;  %2254 = verf.f32 %v988_v14  ;;  %v3441_v55 = vadd.f32 %v3309_v44, %v3062_v26 }
 0x304   :  { %v2237_v46 = vpop.eup %2236  ;;  %1365 = vmatmul.mubr.f32.gmra.mrb[64].mxu0 %v1157_v38  ;;  %1510 = vmatmul.mubr.f32.gmra.mrb[64].mxu1 %v1159_v30  ;;  %v3445_v5 = vadd.f32 %v3311_v62, %v3064_v1  ;;  %v1162_v9 = vmul.f32 %v1098_v10, %v3338_v6  ;;  %v1101_v53 = vadd.f32 1.0, %v2231_v58  ;;  %v914_v20 = vmul.f32 0.5, %v3357_v49  ;;  %v3630_v58 = vld [vmem:[#allocation4_spill] sm:$0xff] }
 0x305   :  { %v2239_v19 = vpop.eup %2238  ;;  %v916_v36 = vmul.f32 0.5, %v3362_v28  ;;  %2256 = verf.f32 %v983_v25  ;;  %v1103_v23 = vadd.f32 1.0, %v2233_v41  ;;  %v1102_v51 = vadd.f32 1.0, %v2235_v40 }
 0x306   :  { %v2241_v61 = vpop.eup %2240  ;;  %v918_v27 = vmul.f32 0.5, %v3376_v42  ;;  %v990_v44 = vmul.f32 0.70710677, %v3441_v55  ;;  %1369 = vmatprep.mubr.f32.mxu0 %v1162_v9  ;;  %2258 = verf.f32 %v985_v47  ;;  %v989_v62 = vmul.f32 0.70710677, %v3433_v29 }
 0x307   :  { %v2243_v45 = vpop.eup %2242  ;;  %v992_v6 = vmul.f32 0.70710677, %v3445_v5  ;;  %v1164_v33 = vmul.f32 %v1100_v12, %v3349_v31  ;;  %2260 = verf.f32 %v987_v3  ;;  %v991_v49 = vmul.f32 0.70710677, %v3437_v43 }
 0x308   :  { %v2245_v35 = vpop.eup %2244  ;;  %v1161_v28 = vmul.f32 %v1097_v4, %v3315_v32  ;;  %v1163_v37 = vmul.f32 %v1099_v22, %v3319_v52  ;;  %v1104_v42 = vadd.f32 1.0, %v2237_v46  ;;  %2262 = verf.f32 %v990_v44 }
 0x309   :  { %v2247_v57 = vpop.eup %2246  ;;  %1514 = vmatprep.mubr.f32.mxu1 %v1164_v33  ;;  %v3460_v48 = vadd.f32 %v3324_v0, %v3058_v63  ;;  %v3464_v41 = vadd.f32 %v3630_v58, %v3060_v39  ;;  %2264 = verf.f32 %v992_v6  ;;  %v3468_v32 = vadd.f32 %v3334_v16, %v3062_v26 }
 0x30a   :  { %v2249_v31 = vpop.eup %2248  ;;  %1370 = vmatmul.mubr.f32.gmra.mrb[66].mxu0 %v1161_v28  ;;  %1515 = vmatmul.mubr.f32.gmra.mrb[66].mxu1 %v1163_v37  ;;  %v3472_v52 = vadd.f32 %v3336_v8, %v3064_v1  ;;  %v1166_v4 = vmul.f32 %v1102_v51, %v3386_v21  ;;  %v1106_v63 = vadd.f32 1.0, %v2243_v45  ;;  %v1108_v0 = vadd.f32 1.0, %v2245_v35 }
 0x30b   :  { %2266 = verf.f32 %v989_v62  ;;  %v993_v39 = vmul.f32 0.70710677, %v3460_v48  ;;  %v2251_v22 = vpop.eup %2250  ;;  %v1105_v10 = vadd.f32 1.0, %v2239_v19  ;;  %v1110_v59 = vadd.f32 1.0, %v2247_v57 }
 0x30c   :  { %2268 = verf.f32 %v991_v49  ;;  %v994_v40 = vmul.f32 0.70710677, %v3468_v32  ;;  %1374 = vmatprep.mubr.f32.mxu0 %v1166_v4  ;;  %v2253_v26 = vpop.eup %2252  ;;  %v1112_v16 = vadd.f32 1.0, %v2249_v31  ;;  %v995_v12 = vmul.f32 0.70710677, %v3464_v41 }
 0x30d   :  { %v996_v1 = vmul.f32 0.70710677, %v3472_v52  ;;  %v1168_v8 = vmul.f32 %v1104_v42, %v3417_v15  ;;  %v2255_v21 = vpop.eup %2254  ;;  %v1107_v25 = vadd.f32 1.0, %v2241_v61  ;;  %2270 = verf.f32 %v993_v39 }
 0x30e   :  { %v1165_v14 = vmul.f32 %v1101_v53, %v3370_v24  ;;  %v1167_v2 = vmul.f32 %v1103_v23, %v3383_v54  ;;  %v920_v38 = vmul.f32 0.5, %v3380_v13  ;;  %2272 = verf.f32 %v994_v40 }
 0x30f   :  { %v2257_v47 = vpop.eup %2256  ;;  %1519 = vmatprep.mubr.f32.mxu1 %v1168_v8  ;;  %v1170_v30 = vmul.f32 %v1106_v63, %v914_v20  ;;  %v1172_v46 = vmul.f32 %v1108_v0, %v916_v36  ;;  %v913_v3 = vmul.f32 0.5, %v3346_v60  ;;  %v915_v19 = vmul.f32 0.5, %v3353_v18 }
 0x310   :  { %v1114_v9 = vadd.f32 1.0, %v2253_v26  ;;  %2274 = verf.f32 %v996_v1  ;;  %1375 = vmatmul.mubr.f32.gmra.mrb[68].mxu0 %v1165_v14  ;;  %1520 = vmatmul.mubr.f32.gmra.mrb[68].mxu1 %v1167_v2  ;;  %v2259_v15 = vpop.eup %2258  ;;  %v1116_v61 = vadd.f32 1.0, %v2255_v21  ;;  %v1174_v24 = vmul.f32 %v1110_v59, %v918_v27 }
 0x311   :  { %2276 = verf.f32 %v995_v12  ;;  %1379 = vmatprep.mubr.f32.mxu0 %v1170_v30  ;;  %1524 = vmatprep.mubr.f32.mxu1 %v1172_v46  ;;  %v1176_v54 = vmul.f32 %v1112_v16, %v920_v38  ;;  %v2261_v13 = vpop.eup %2260  ;;  %v1109_v53 = vadd.f32 1.0, %v2251_v22  ;;  %v1111_v45 = vadd.f32 1.0, %v2257_v47  ;;  %v3502_v30 = vld [vmem:[%s3623_s7] ss:$0 sm:$0xff] }
 0x312   :  { %v1169_v20 = vmul.f32 %v1105_v10, %v913_v3  ;;  %v1171_v36 = vmul.f32 %v1107_v25, %v915_v19  ;;  %v2263_v23 = vpop.eup %2262  ;;  %v922_v60 = vmul.f32 0.5, %v3409_v56  ;;  %v924_v18 = vmul.f32 0.5, %v3413_v11 }
 0x313   :  { %v2265_v51 = vpop.eup %2264  ;;  %v917_v44 = vmul.f32 0.5, %v3390_v34  ;;  %v919_v35 = vmul.f32 0.5, %v3400_v7  ;;  %v1118_v27 = vadd.f32 1.0, %v2263_v23  ;;  %v1113_v37 = vadd.f32 1.0, %v2259_v15 }
 0x314   :  { %1380 = vmatmul.mubr.f32.gmra.mrb[70].mxu0 %v1169_v20  ;;  %1525 = vmatmul.mubr.f32.gmra.mrb[70].mxu1 %v1171_v36  ;;  %v1120_v6 = vadd.f32 1.0, %v2265_v51  ;;  %v1178_v33 = vmul.f32 %v1114_v9, %v922_v60  ;;  %v1180_v49 = vmul.f32 %v1116_v61, %v924_v18  ;;  %v1115_v57 = vadd.f32 1.0, %v2261_v13  ;;  %v2278_v13 = vld [vmem:[%s3617_s0] sm:$0xff] }
 0x315   :  { %v2267_v62 = vpop.eup %2266  ;;  %1384 = vmatprep.mubr.f32.mxu0 %v1174_v24  ;;  %1529 = vmatprep.mubr.f32.mxu1 %v1176_v54  ;;  %v1173_v56 = vmul.f32 %v1109_v53, %v917_v44  ;;  %v1175_v42 = vmul.f32 %v1111_v45, %v919_v35  ;;  %v926_v11 = vmul.f32 0.5, %v3441_v55  ;;  %v928_v34 = vmul.f32 0.5, %v3445_v5  ;;  %v2279_v44 = vld [vmem:[%s3617_s0 + $0x8] sm:$0xff] }
 0x316   :  { %v2269_v28 = vpop.eup %2268  ;;  %v921_v7 = vmul.f32 0.5, %v3404_v50  ;;  %v923_v31 = vmul.f32 0.5, %v3421_v17  ;;  %v1117_v63 = vadd.f32 1.0, %v2267_v62  ;;  %v930_v5 = vmul.f32 0.5, %v3468_v32 }
 0x317   :  { %v2271_v58 = vpop.eup %2270  ;;  %v1182_v0 = vmul.f32 %v1118_v27, %v926_v11  ;;  %v1184_v39 = vmul.f32 %v1120_v6, %v928_v34  ;;  %v1119_v10 = vadd.f32 1.0, %v2269_v28  ;;  %v932_v50 = vmul.f32 0.5, %v3472_v52 }
 0x318   :  { %1385 = vmatmul.mubr.f32.gmra.mrb[72].mxu0 %v1173_v56  ;;  %1530 = vmatmul.mubr.f32.gmra.mrb[72].mxu1 %v1175_v42  ;;  %v2273_v4 = vpop.eup %2272  ;;  %v1177_v40 = vmul.f32 %v1113_v37, %v921_v7  ;;  %v1179_v55 = vmul.f32 %v1115_v57, %v923_v31  ;;  %v925_v17 = vmul.f32 0.5, %v3433_v29  ;;  %v927_v12 = vmul.f32 0.5, %v3437_v43  ;;  %v2280_v56 = vld [vmem:[%s3617_s0 + $0x10] sm:$0xff] }
 0x319   :  { %1389 = vmatprep.mubr.f32.mxu0 %v1178_v33  ;;  %1534 = vmatprep.mubr.f32.mxu1 %v1180_v49  ;;  %v1122_v59 = vadd.f32 1.0, %v2273_v4  ;;  %v1121_v21 = vadd.f32 1.0, %v2271_v58  ;;  %v929_v47 = vmul.f32 0.5, %v3460_v48  ;;  %v931_v32 = vmul.f32 0.5, %v3464_v41 }
 0x31a   :  { %v2275_v22 = vpop.eup %2274  ;;  %v1181_v14 = vmul.f32 %v1117_v63, %v925_v17  ;;  %v1183_v2 = vmul.f32 %v1119_v10, %v927_v12  ;;  %v2282_v12 = vld [vmem:[%s3617_s0 + $0x20] sm:$0xff] }
 0x31b   :  { %v2277_v26 = vpop.eup %2276  ;;  %v1124_v16 = vadd.f32 1.0, %v2275_v22  ;;  %v1186_v1 = vmul.f32 %v1122_v59, %v930_v5  ;;  %v1185_v29 = vmul.f32 %v1121_v21, %v929_v47  ;;  %v2281_v22 = vld [vmem:[%s3617_s0 + $0x18] sm:$0xff] }
 0x31c   :  { %1390 = vmatmul.mubr.f32.gmra.mrb[74].mxu0 %v1177_v40  ;;  %1535 = vmatmul.mubr.f32.gmra.mrb[74].mxu1 %v1179_v55  ;;  %v1123_v25 = vadd.f32 1.0, %v2277_v26 }
 0x31d   :  { %1394 = vmatprep.mubr.f32.mxu0 %v1182_v0  ;;  %1539 = vmatprep.mubr.f32.mxu1 %v1184_v39  ;;  %v1188_v8 = vmul.f32 %v1124_v16, %v932_v50 }
 0x31e   :  { %v1187_v43 = vmul.f32 %v1123_v25, %v931_v32 }
 0x320   :  { %1395 = vmatmul.mubr.f32.gmra.mrb[76].mxu0 %v1181_v14  ;;  %1540 = vmatmul.mubr.f32.gmra.mrb[76].mxu1 %v1183_v2 }
 0x321   :  { %1399 = vmatprep.mubr.f32.mxu0 %v1186_v1  ;;  %1544 = vmatprep.mubr.f32.mxu1 %v1188_v8 }
 0x324   :  { %1400 = vmatmul.mubr.f32.gmra.mrb[78].mxu0 %v1185_v29  ;;  %1545 = vmatmul.mubr.f32.gmra.mrb[78].mxu1 %v1187_v43  ;;  %v2283_v43 = vld [vmem:[%s3617_s0 + $0x28] sm:$0xff] }
 0x3a6   :  { %v1685_v52 = vpop.f32.mrb[48].mxu0 }
 0x3a7   :  { %v1686_v46 = vpop.f32.mrb[49].mxu0 }
 0x3a8   :  { %v1765_v38 = vpop.f32.mrb[48].mxu1  ;;  %v1687_v48 = vadd.f32 %v1686_v46, %v1685_v52 }
 0x3a9   :  { %v1766_v3 = vpop.f32.mrb[49].mxu1 }
 0x3aa   :  { %v1767_v19 = vadd.f32 %v1766_v3, %v1765_v38  ;;  %v1327_v41 = vadd.f32 %v1687_v48, %v3502_v30 }
 0x3ac   :  { %v1472_v9 = vadd.f32 %v1767_v19, %v1327_v41 }
 0x3ad   :  { %v1688_v15 = vpop.f32.mrb[50].mxu0 }
 0x3ae   :  { %v1768_v61 = vpop.f32.mrb[50].mxu1  ;;  %v1689_v24 = vpop.f32.mrb[51].mxu0  ;;  %v1550_v53 = vadd.f32 %v2278_v13, %v1472_v9 }
 0x3af   :  { %v1769_v54 = vpop.f32.mrb[51].mxu1  ;;  %v1690_v45 = vadd.f32 %v1689_v24, %v1688_v15 }
 0x3b0   :  { %v1770_v20 = vadd.f32 %v1769_v54, %v1768_v61  ;;  %1566 = vst [vmem:[%s3624_s8] sm:$0xff] %v1550_v53  ;;  %v2284_v61 = vld [vmem:[%s3617_s0 + $0x30] sm:$0xff] }
 0x3b1   :  { %v1332_v36 = vadd.f32 %v1690_v45, %v3502_v30 }
 0x3b2   :  { %v1691_v60 = vpop.f32.mrb[52].mxu0 }
 0x3b3   :  { %v1477_v23 = vadd.f32 %v1770_v20, %v1332_v36  ;;  %v1692_v51 = vpop.f32.mrb[53].mxu0 }
 0x3b4   :  { %v1771_v18 = vpop.f32.mrb[52].mxu1  ;;  %v1693_v62 = vadd.f32 %v1692_v51, %v1691_v60 }
 0x3b5   :  { %v1551_v35 = vadd.f32 %v2279_v44, %v1477_v23  ;;  %v1772_v27 = vpop.f32.mrb[53].mxu1 }
 0x3b6   :  { %v1773_v6 = vadd.f32 %v1772_v27, %v1771_v18  ;;  %v1337_v33 = vadd.f32 %v1693_v62, %v3502_v30  ;;  %v2285_v18 = vld [vmem:[%s3617_s0 + $0x38] sm:$0xff] }
 0x3b7   :  { %1567 = vst [vmem:[%s3624_s8 + $0x8] sm:$0xff] %v1551_v35 }
 0x3b8   :  { %v1482_v49 = vadd.f32 %v1773_v6, %v1337_v33 }
 0x3ba   :  { %v1552_v42 = vadd.f32 %v2280_v56, %v1482_v49 }
 0x3bb   :  { %v1694_v28 = vpop.f32.mrb[54].mxu0 }
 0x3bc   :  { %v1695_v57 = vpop.f32.mrb[55].mxu0  ;;  %1568 = vst [vmem:[%s3624_s8 + $0x10] sm:$0xff] %v1552_v42 }
 0x3bd   :  { %v1774_v37 = vpop.f32.mrb[54].mxu1  ;;  %v1696_v11 = vadd.f32 %v1695_v57, %v1694_v28 }
 0x3be   :  { %v1775_v34 = vpop.f32.mrb[55].mxu1 }
 0x3bf   :  { %v1776_v58 = vadd.f32 %v1775_v34, %v1774_v37  ;;  %v1342_v7 = vadd.f32 %v1696_v11, %v3502_v30  ;;  %v1697_v4 = vpop.f32.mrb[56].mxu0  ;;  %v2286_v37 = vld [vmem:[%s3617_s0 + $0x40] sm:$0xff] }
 0x3c0   :  { %v1698_v0 = vpop.f32.mrb[57].mxu0 }
 0x3c1   :  { %v1487_v31 = vadd.f32 %v1776_v58, %v1342_v7  ;;  %v1699_v59 = vadd.f32 %v1698_v0, %v1697_v4 }
 0x3c2   :  { %v1777_v63 = vpop.f32.mrb[56].mxu1 }
 0x3c3   :  { %v1778_v39 = vpop.f32.mrb[57].mxu1  ;;  %v1553_v10 = vadd.f32 %v2281_v22, %v1487_v31  ;;  %v1347_v55 = vadd.f32 %v1699_v59, %v3502_v30 }
 0x3c4   :  { %v1779_v40 = vadd.f32 %v1778_v39, %v1777_v63  ;;  %v1700_v5 = vpop.f32.mrb[58].mxu0  ;;  %v2287_v63 = vld [vmem:[%s3617_s0 + $0x48] sm:$0xff] }
 0x3c5   :  { %1569 = vst [vmem:[%s3624_s8 + $0x18] sm:$0xff] %v1553_v10  ;;  %v1701_v16 = vpop.f32.mrb[59].mxu0 }
 0x3c6   :  { %v1492_v26 = vadd.f32 %v1779_v40, %v1347_v55  ;;  %v1780_v50 = vpop.f32.mrb[58].mxu1  ;;  %v1702_v8 = vadd.f32 %v1701_v16, %v1700_v5 }
 0x3c7   :  { %v1781_v17 = vpop.f32.mrb[59].mxu1 }
 0x3c8   :  { %v1554_v1 = vadd.f32 %v2282_v12, %v1492_v26  ;;  %v1782_v21 = vadd.f32 %v1781_v17, %v1780_v50  ;;  %v1352_v25 = vadd.f32 %v1702_v8, %v3502_v30  ;;  %v2288_v17 = vld [vmem:[%s3617_s0 + $0x50] sm:$0xff] }
 0x3ca   :  { %1570 = vst [vmem:[%s3624_s8 + $0x20] sm:$0xff] %v1554_v1  ;;  %v1497_v14 = vadd.f32 %v1782_v21, %v1352_v25  ;;  %v1703_v2 = vpop.f32.mrb[60].mxu0  ;;  %v1783_v47 = vpop.f32.mrb[60].mxu1 }
 0x3cb   :  { %v1704_v32 = vpop.f32.mrb[61].mxu0  ;;  %v1784_v29 = vpop.f32.mrb[61].mxu1 }
 0x3cc   :  { %v1555_v52 = vadd.f32 %v2283_v43, %v1497_v14  ;;  %v1705_v38 = vadd.f32 %v1704_v32, %v1703_v2  ;;  %v1785_v46 = vadd.f32 %v1784_v29, %v1783_v47  ;;  %v2289_v29 = vld [vmem:[%s3617_s0 + $0x58] sm:$0xff] }
 0x3ce   :  { %1571 = vst [vmem:[%s3624_s8 + $0x28] sm:$0xff] %v1555_v52  ;;  %v1357_v3 = vadd.f32 %v1705_v38, %v3502_v30 }
 0x3d0   :  { %v1502_v48 = vadd.f32 %v1785_v46, %v1357_v3  ;;  %v1706_v19 = vpop.f32.mrb[62].mxu0  ;;  %v1786_v41 = vpop.f32.mrb[62].mxu1 }
 0x3d1   :  { %v1707_v9 = vpop.f32.mrb[63].mxu0  ;;  %v1787_v15 = vpop.f32.mrb[63].mxu1 }
 0x3d2   :  { %v1556_v24 = vadd.f32 %v2284_v61, %v1502_v48  ;;  %v1708_v54 = vadd.f32 %v1707_v9, %v1706_v19  ;;  %v1788_v13 = vadd.f32 %v1787_v15, %v1786_v41  ;;  %v2290_v15 = vld [vmem:[%s3617_s0 + $0x60] sm:$0xff] }
 0x3d4   :  { %1572 = vst [vmem:[%s3624_s8 + $0x30] sm:$0xff] %v1556_v24  ;;  %v1362_v53 = vadd.f32 %v1708_v54, %v3502_v30 }
 0x3d6   :  { %v1507_v45 = vadd.f32 %v1788_v13, %v1362_v53 }
 0x3d7   :  { %v1709_v20 = vpop.f32.mrb[64].mxu0  ;;  %v1789_v36 = vpop.f32.mrb[64].mxu1 }
 0x3d8   :  { %v1710_v23 = vpop.f32.mrb[65].mxu0  ;;  %v1790_v60 = vpop.f32.mrb[65].mxu1  ;;  %v1557_v51 = vadd.f32 %v2285_v18, %v1507_v45 }
 0x3d9   :  { %v1711_v44 = vadd.f32 %v1710_v23, %v1709_v20  ;;  %v1791_v35 = vadd.f32 %v1790_v60, %v1789_v36  ;;  %v2291_v60 = vld [vmem:[%s3617_s0 + $0x68] sm:$0xff] }
 0x3da   :  { %1573 = vst [vmem:[%s3624_s8 + $0x38] sm:$0xff] %v1557_v51 }
 0x3db   :  { %v1367_v62 = vadd.f32 %v1711_v44, %v3502_v30 }
 0x3dd   :  { %v1512_v27 = vadd.f32 %v1791_v35, %v1367_v62  ;;  %v1712_v6 = vpop.f32.mrb[66].mxu0  ;;  %v1792_v33 = vpop.f32.mrb[66].mxu1 }
 0x3de   :  { %v1713_v49 = vpop.f32.mrb[67].mxu0  ;;  %v1793_v28 = vpop.f32.mrb[67].mxu1 }
 0x3df   :  { %v1558_v57 = vadd.f32 %v2286_v37, %v1512_v27  ;;  %v1714_v56 = vadd.f32 %v1713_v49, %v1712_v6  ;;  %v1794_v42 = vadd.f32 %v1793_v28, %v1792_v33  ;;  %v2292_v28 = vld [vmem:[%s3617_s0 + $0x70] sm:$0xff] }
 0x3e1   :  { %1574 = vst [vmem:[%s3624_s8 + $0x40] sm:$0xff] %v1558_v57  ;;  %v1372_v11 = vadd.f32 %v1714_v56, %v3502_v30 }
 0x3e3   :  { %v1517_v34 = vadd.f32 %v1794_v42, %v1372_v11  ;;  %v1715_v58 = vpop.f32.mrb[68].mxu0  ;;  %v1795_v7 = vpop.f32.mrb[68].mxu1  ;;  %v2293_v42 = vld [vmem:[%s3617_s0 + $0x78] sm:$0xff] }
 0x3e4   :  { %v1716_v31 = vpop.f32.mrb[69].mxu0  ;;  %v1796_v4 = vpop.f32.mrb[69].mxu1 }
 0x3e5   :  { %v1559_v0 = vadd.f32 %v2287_v63, %v1517_v34  ;;  %v1717_v39 = vadd.f32 %v1716_v31, %v1715_v58  ;;  %v1797_v22 = vadd.f32 %v1796_v4, %v1795_v7 }
 0x3e7   :  { %1575 = vst [vmem:[%s3624_s8 + $0x48] sm:$0xff] %v1559_v0  ;;  %v1377_v10 = vadd.f32 %v1717_v39, %v3502_v30  ;;  %v1718_v59 = vpop.f32.mrb[70].mxu0  ;;  %v1798_v40 = vpop.f32.mrb[70].mxu1 }
 0x3e8   :  { %v1719_v55 = vpop.f32.mrb[71].mxu0  ;;  %v1799_v26 = vpop.f32.mrb[71].mxu1 }
 0x3e9   :  { %v1522_v5 = vadd.f32 %v1797_v22, %v1377_v10  ;;  %v1720_v50 = vadd.f32 %v1719_v55, %v1718_v59  ;;  %v1800_v16 = vadd.f32 %v1799_v26, %v1798_v40 }
 0x3eb   :  { %v1560_v12 = vadd.f32 %v2288_v17, %v1522_v5  ;;  %v1382_v1 = vadd.f32 %v1720_v50, %v3502_v30  ;;  %v1721_v8 = vpop.f32.mrb[72].mxu0  ;;  %v1801_v21 = vpop.f32.mrb[72].mxu1 }
 0x3ec   :  { %v1722_v25 = vpop.f32.mrb[73].mxu0  ;;  %v1802_v14 = vpop.f32.mrb[73].mxu1 }
 0x3ed   :  { %1576 = vst [vmem:[%s3624_s8 + $0x50] sm:$0xff] %v1560_v12  ;;  %v1527_v2 = vadd.f32 %v1800_v16, %v1382_v1  ;;  %v1723_v47 = vadd.f32 %v1722_v25, %v1721_v8  ;;  %v1803_v32 = vadd.f32 %v1802_v14, %v1801_v21 }
 0x3ef   :  { %v1561_v43 = vadd.f32 %v2289_v29, %v1527_v2  ;;  %v1387_v52 = vadd.f32 %v1723_v47, %v3502_v30  ;;  %v1724_v38 = vpop.f32.mrb[74].mxu0  ;;  %v1804_v46 = vpop.f32.mrb[74].mxu1 }
 0x3f0   :  { %v1725_v3 = vpop.f32.mrb[75].mxu0  ;;  %v1805_v48 = vpop.f32.mrb[75].mxu1 }
 0x3f1   :  { %1577 = vst [vmem:[%s3624_s8 + $0x58] sm:$0xff] %v1561_v43  ;;  %v1532_v19 = vadd.f32 %v1803_v32, %v1387_v52  ;;  %v1726_v41 = vadd.f32 %v1725_v3, %v1724_v38  ;;  %v1806_v9 = vadd.f32 %v1805_v48, %v1804_v46 }
 0x3f3   :  { %v1562_v61 = vadd.f32 %v2290_v15, %v1532_v19  ;;  %v1392_v24 = vadd.f32 %v1726_v41, %v3502_v30  ;;  %v1727_v54 = vpop.f32.mrb[76].mxu0  ;;  %v1807_v13 = vpop.f32.mrb[76].mxu1 }
 0x3f4   :  { %v1728_v53 = vpop.f32.mrb[77].mxu0  ;;  %v1808_v45 = vpop.f32.mrb[77].mxu1 }
 0x3f5   :  { %1578 = vst [vmem:[%s3624_s8 + $0x60] sm:$0xff] %v1562_v61  ;;  %v1537_v20 = vadd.f32 %v1806_v9, %v1392_v24  ;;  %v1729_v36 = vadd.f32 %v1728_v53, %v1727_v54  ;;  %v1809_v23 = vadd.f32 %v1808_v45, %v1807_v13 }
 0x3f7   :  { %v1563_v18 = vadd.f32 %v2291_v60, %v1537_v20  ;;  %v1397_v51 = vadd.f32 %v1729_v36, %v3502_v30  ;;  %v1730_v44 = vpop.f32.mrb[78].mxu0  ;;  %v1810_v35 = vpop.f32.mrb[78].mxu1 }
 0x3f8   :  { %v1731_v62 = vpop.f32.mrb[79].mxu0  ;;  %v1811_v27 = vpop.f32.mrb[79].mxu1 }
 0x3f9   :  { %1579 = vst [vmem:[%s3624_s8 + $0x68] sm:$0xff] %v1563_v18  ;;  %v1542_v6 = vadd.f32 %v1809_v23, %v1397_v51  ;;  %v1732_v33 = vadd.f32 %v1731_v62, %v1730_v44  ;;  %v1812_v49 = vadd.f32 %v1811_v27, %v1810_v35 }
 0x3fb   :  { %v1564_v37 = vadd.f32 %v2292_v28, %v1542_v6  ;;  %v1402_v57 = vadd.f32 %v1732_v33, %v3502_v30 }
 0x3fd   :  { %1580 = vst [vmem:[%s3624_s8 + $0x70] sm:$0xff] %v1564_v37  ;;  %v1547_v56 = vadd.f32 %v1812_v49, %v1402_v57 }
 0x3ff   :  { %v1565_v11 = vadd.f32 %v2293_v42, %v1547_v56 }
 0x401   :  { %1581 = vst [vmem:[%s3624_s8 + $0x78] sm:$0xff] %v1565_v11 }

</bundles_post_ra>
